<compile_context>
chip_gen: v7x
topology: tpu7x:2x2x1
jax: 0.10.0
libtpu: 0.0.40
codegen_flags: <defaults>
</compile_context>

<pallas_src>
import functools

import jax
import jax.numpy as jnp
from jax.experimental import pallas as pl
from jax.experimental.pallas import tpu as pltpu


# ----------------------------------------------------------------------------
# Pallas kernel: entire LSK block for one batch element.
# ----------------------------------------------------------------------------
def _lsk_kernel(x_ref, w0_ref, b0_ref, ws_ref, bs_ref,
                wbd_ref, b12_ref, wsq_ref, bsq_ref, w3c_ref, b3_ref,
                o_ref, *, valid_len):
    f32 = jnp.float32
    exact = jax.lax.Precision.HIGHEST
    nt = (((1,), (1,)), ((), ()))        # contract last dims   ("A @ B.T")
    tn = (((0,), (0,)), ((), ()))        # contract first dims  ("A.T @ B")

    x_tc = x_ref[0]                      # (Lp, C) time-major, as stored in HBM
    Lp, C = x_tc.shape
    half = C // 2

    # ---- layout change (Lp, C) -> (C, Lp) as an exact identity matmul (MXU),
    #      avoiding both an HBM transpose pass and an in-kernel transpose op.
    eye_c = (jax.lax.broadcasted_iota(jnp.int32, (C, C), 0) ==
             jax.lax.broadcasted_iota(jnp.int32, (C, C), 1)).astype(f32)
    x = jax.lax.dot_general(eye_c, x_tc, nt, precision=exact,
                            preferred_element_type=f32)              # (C, Lp)

    # Hoisted lane-position iota shared by every masked shift below.
    t_idx = jax.lax.broadcasted_iota(jnp.int32, (1, Lp), 1)

    def shift(a, s):
        # out[:, t] = a[:, t + s], zero outside the valid region [0, valid_len)
        if s == 0:
            return a
        rolled = pltpu.roll(a, (-s) % Lp, axis=1)   # out[:, t] = a[:, (t+s)%Lp]
        if s < 0:
            mask = t_idx >= -s                      # zero the wrapped prefix
        else:
            mask = t_idx < (valid_len - s)          # zero the wrapped/pad tail
        return jnp.where(mask, rolled, 0.0)

    def dwconv(a, w, b, k, dil, pad):
        # depthwise conv along T:
        #   out[c, t] = sum_k w[c, k] * a[c, t + k*dil - pad] + b[c]
        acc = w[:, 0:1] * shift(a, -pad)
        for kk in range(1, k):
            acc = acc + w[:, kk:kk + 1] * shift(a, kk * dil - pad)
        return acc + b

    attn1 = dwconv(x, w0_ref[...], b0_ref[...], k=5, dil=1, pad=2)       # (C,Lp)
    attn2 = dwconv(attn1, ws_ref[...], bs_ref[...], k=7, dil=3, pad=9)   # (C,Lp)

    # ---- conv1/conv2 fused: [a1; a2] = blockdiag(w1, w2) @ [attn1; attn2]
    cat12 = jnp.concatenate([attn1, attn2], axis=0)                      # (2C,Lp)
    a12 = jnp.dot(wbd_ref[...], cat12,
                  preferred_element_type=f32) + b12_ref[...]             # (C,Lp)

    # channel mean / max over cat([a1, a2]) == rows of a12
    avg = jnp.sum(a12, axis=0, keepdims=True) * (1.0 / C)                # (1,Lp)
    mx = jnp.max(a12, axis=0, keepdims=True)                             # (1,Lp)
    agg = jnp.concatenate([avg, mx], axis=0)                             # (2,Lp)

    # ---- conv_squeeze (2->2, k=7, pad=3), vectorized on (2, Lp):
    #      per tap a (2,2) channel mix applied as two broadcast FMAs.
    wsq = wsq_ref[...]                   # (7, 2, 2) = [tap, out_ch, in_ch]
    sh = shift(agg, -3)
    sq = wsq[0, :, 0:1] * sh[0:1, :] + wsq[0, :, 1:2] * sh[1:2, :]
    for kk in range(1, 7):
        sh = shift(agg, kk - 3)
        sq = sq + wsq[kk, :, 0:1] * sh[0:1, :] + wsq[kk, :, 1:2] * sh[1:2, :]
    sig = jax.nn.sigmoid(sq + bsq_ref[...])                              # (2,Lp)

    # ---- gated mix + final 1x1 conv as [w3 | w3] @ [a1*sig0 ; a2*sig1]
    row_idx = jax.lax.broadcasted_iota(jnp.int32, (C, 1), 0)
    gate = jnp.where(row_idx < half, sig[0:1, :], sig[1:2, :])           # (C,Lp)
    attn = jnp.dot(w3c_ref[...], a12 * gate,
                   preferred_element_type=f32) + b3_ref[...]             # (C,Lp)

    # ---- back to time-major with the *small* (C, C) identity (transposed-LHS
    #      contraction, O(Lp*C^2); no (Lp, Lp) identity, no XLU transpose),
    #      then gate the original HBM-layout x rows exactly.
    attn_tc = jax.lax.dot_general(attn, eye_c, tn, precision=exact,
                                  preferred_element_type=f32)            # (Lp,C)
    o_ref[0] = x_tc * attn_tc


# ----------------------------------------------------------------------------
# Wrapper
# ----------------------------------------------------------------------------
def lsk_block_1d(x, params):
    """x: (N, L, dim) float32 -> (N, L, dim) float32, matching LSKblock1D.forward."""
    N, L, dim = x.shape
    half = dim // 2
    Lp = ((L + 127) // 128) * 128                  # lane-dense sequence length
    x_p = x if Lp == L else jnp.pad(x, ((0, 0), (0, Lp - L), (0, 0)))

    f32 = jnp.float32
    w0 = params["w0"].reshape(dim, 5).astype(f32)
    b0 = params["b0"].reshape(dim, 1).astype(f32)
    ws = params["ws"].reshape(dim, 7).astype(f32)
    bs = params["bs"].reshape(dim, 1).astype(f32)
    w1 = params["w1"].reshape(half, dim).astype(f32)
    w2 = params["w2"].reshape(half, dim).astype(f32)
    zhd = jnp.zeros((half, dim), f32)
    w_bd = jnp.concatenate(
        [jnp.concatenate([w1, zhd], axis=1),
         jnp.concatenate([zhd, w2], axis=1)], axis=0)                 # (dim, 2dim)
    b12 = jnp.concatenate([params["b1"].reshape(half, 1),
                           params["b2"].reshape(half, 1)], axis=0).astype(f32)
    wsq = jnp.transpose(params["wsq"], (2, 0, 1)).astype(f32)         # (7, 2, 2)
    bsq = params["bsq"].reshape(2, 1).astype(f32)
    w3 = params["w3"].reshape(dim, half).astype(f32)
    w3c = jnp.concatenate([w3, w3], axis=1)                           # (dim, dim)
    b3 = params["b3"].reshape(dim, 1).astype(f32)

    def wspec(shape):
        zeros = (0,) * len(shape)
        return pl.BlockSpec(shape, lambda n, _z=zeros: _z)

    in_specs = [
        pl.BlockSpec((1, Lp, dim), lambda n: (n, 0, 0)),   # x (time-major)
        wspec((dim, 5)), wspec((dim, 1)),                  # conv0
        wspec((dim, 7)), wspec((dim, 1)),                  # conv_spatial
        wspec((dim, 2 * dim)), wspec((dim, 1)),            # fused conv1/conv2
        wspec((7, 2, 2)), wspec((2, 1)),                   # conv_squeeze
        wspec((dim, dim)), wspec((dim, 1)),                # final 1x1 conv
    ]

    out = pl.pallas_call(
        functools.partial(_lsk_kernel, valid_len=L),
        out_shape=jax.ShapeDtypeStruct((N, Lp, dim), f32),
        grid=(N,),
        in_specs=in_specs,
        out_specs=pl.BlockSpec((1, Lp, dim), lambda n: (n, 0, 0)),
        compiler_params=pltpu.CompilerParams(
            dimension_semantics=("parallel",),
            vmem_limit_bytes=32 * 1024 * 1024),
    )(x_p, w0, b0, ws, bs, w_bd, b12, wsq, bsq, w3c, b3)
    # TODO(synk): for very long sequences, add a T grid axis with a 14-element
    # receptive-field halo (and fold small batches per grid step) instead of
    # loading the full (Lp, dim) slab per step.
    return out if Lp == L else out[:, :L, :]


# ----------------------------------------------------------------------------
# Pure-JAX reference (mirrors torch Conv1d semantics) for verification.
# ----------------------------------------------------------------------------
def _conv1d(x, w, b, pad, dil=1, groups=1):
    out = jax.lax.conv_general_dilated(
        x, w, window_strides=(1,), padding=[(pad, pad)], rhs_dilation=(dil,),
        dimension_numbers=("NCH", "OIH", "NCH"), feature_group_count=groups,
        precision=jax.lax.Precision.HIGHEST)
    return out + b[None, :, None]


def lsk_reference(x, p):
    dim = x.shape[2]
    xT = jnp.transpose(x, (0, 2, 1))
    attn1 = _conv1d(xT, p["w0"], p["b0"], pad=2, dil=1, groups=dim)
    attn2 = _conv1d(attn1, p["ws"], p["bs"], pad=9, dil=3, groups=dim)
    a1 = _conv1d(attn1, p["w1"], p["b1"], pad=0)
    a2 = _conv1d(attn2, p["w2"], p["b2"], pad=0)
    attn = jnp.concatenate([a1, a2], axis=1)
    avg = jnp.mean(attn, axis=1, keepdims=True)
    mx = jnp.max(attn, axis=1, keepdims=True)
    agg = jnp.concatenate([avg, mx], axis=1)
    sig = jax.nn.sigmoid(_conv1d(agg, p["wsq"], p["bsq"], pad=3))
    attn = a1 * sig[:, 0:1, :] + a2 * sig[:, 1:2, :]
    attn = _conv1d(attn, p["w3"], p["b3"], pad=0)
    y = xT * attn
    return jnp.transpose(y, (0, 2, 1))


# ----------------------------------------------------------------------------
def make_params(dim, key):
    half = dim // 2
    keys = jax.random.split(key, 12)
    n = lambda k, shape, s=0.2: (s * jax.random.normal(k, shape)).astype(jnp.float32)
    return {
        "w0": n(keys[0], (dim, 1, 5)),     "b0": n(keys[1], (dim,), 0.05),
        "ws": n(keys[2], (dim, 1, 7)),     "bs": n(keys[3], (dim,), 0.05),
        "w1": n(keys[4], (half, dim, 1)),  "b1": n(keys[5], (half,), 0.05),
        "w2": n(keys[6], (half, dim, 1)),  "b2": n(keys[7], (half,), 0.05),
        "wsq": n(keys[8], (2, 2, 7)),      "bsq": n(keys[9], (2,), 0.05),
        "w3": n(keys[10], (dim, half, 1)), "b3": n(keys[11], (dim,), 0.05),
    }


if __name__ == "__main__":
    N, L, dim = 2, 128, 8
    key = jax.random.PRNGKey(0)
    kx, kp = jax.random.split(key)
    x = jax.random.normal(kx, (N, L, dim), dtype=jnp.float32)
    params = make_params(dim, kp)

    y = jax.jit(lsk_block_1d)(x, params)
    y = jax.block_until_ready(y)

    y_ref = jax.block_until_ready(lsk_reference(x, params))
    assert y.shape == (N, L, dim)
    # Default (single-pass bf16) MXU precision on the pointwise convs vs. the
    # HIGHEST-precision reference -> loosened tolerance.
    max_err = float(jnp.max(jnp.abs(y - y_ref)))
    assert jnp.allclose(y, y_ref, rtol=2e-2, atol=2e-2), max_err

    print("KERNEL_OK")
</pallas_src>

<mosaic_0001>
module attributes {stable_mosaic.version = 11 : i64} {
  func.func @_lsk_kernel(%arg0: i32, %arg1: memref<1x128x8xf32, #tpu.memory_space<vmem>>, %arg2: memref<8x5xf32, #tpu.memory_space<vmem>>, %arg3: memref<8x1xf32, #tpu.memory_space<vmem>>, %arg4: memref<8x7xf32, #tpu.memory_space<vmem>>, %arg5: memref<8x1xf32, #tpu.memory_space<vmem>>, %arg6: memref<8x16xf32, #tpu.memory_space<vmem>>, %arg7: memref<8x1xf32, #tpu.memory_space<vmem>>, %arg8: memref<7x2x2xf32, #tpu.memory_space<vmem>>, %arg9: memref<2x1xf32, #tpu.memory_space<vmem>>, %arg10: memref<8x8xf32, #tpu.memory_space<vmem>>, %arg11: memref<8x1xf32, #tpu.memory_space<vmem>>, %arg12: memref<1x128x8xf32, #tpu.memory_space<vmem>>) attributes {dimension_semantics = [#tpu.dimension_semantics<parallel>], iteration_bounds = array<i64: 2>, scalar_prefetch = 0 : i64, scratch_operands = 0 : i64, tpu.core_type = #tpu.core_type<tc>, window_params = [{transform_indices = @transform_0, window_bounds = array<i64: 1, 128, 8>}, {pipeline_mode = #tpu.pipeline_mode<synchronous>, transform_indices = @transform_1, window_bounds = array<i64: 8, 5>}, {pipeline_mode = #tpu.pipeline_mode<synchronous>, transform_indices = @transform_2, window_bounds = array<i64: 8, 1>}, {pipeline_mode = #tpu.pipeline_mode<synchronous>, transform_indices = @transform_3, window_bounds = array<i64: 8, 7>}, {pipeline_mode = #tpu.pipeline_mode<synchronous>, transform_indices = @transform_4, window_bounds = array<i64: 8, 1>}, {pipeline_mode = #tpu.pipeline_mode<synchronous>, transform_indices = @transform_5, window_bounds = array<i64: 8, 16>}, {pipeline_mode = #tpu.pipeline_mode<synchronous>, transform_indices = @transform_6, window_bounds = array<i64: 8, 1>}, {pipeline_mode = #tpu.pipeline_mode<synchronous>, transform_indices = @transform_7, window_bounds = array<i64: 7, 2, 2>}, {pipeline_mode = #tpu.pipeline_mode<synchronous>, transform_indices = @transform_8, window_bounds = array<i64: 2, 1>}, {pipeline_mode = #tpu.pipeline_mode<synchronous>, transform_indices = @transform_9, window_bounds = array<i64: 8, 8>}, {pipeline_mode = #tpu.pipeline_mode<synchronous>, transform_indices = @transform_10, window_bounds = array<i64: 8, 1>}, {transform_indices = @transform_11, window_bounds = array<i64: 1, 128, 8>}]} {
    %c0 = arith.constant 0 : index
    %c0_0 = arith.constant 0 : index
    %c0_1 = arith.constant 0 : index
    %0 = vector.load %arg1[%c0, %c0_0, %c0_1] : memref<1x128x8xf32, #tpu.memory_space<vmem>>, vector<1x128x8xf32>
    %1 = vector.shape_cast %0 : vector<1x128x8xf32> to vector<128x8xf32>
    %2 = tpu.iota {dimensions = array<i32: 0>} : vector<8x8xi32>
    %3 = tpu.iota {dimensions = array<i32: 1>} : vector<8x8xi32>
    %4 = arith.cmpi eq, %2, %3 : vector<8x8xi32>
    %5 = arith.extui %4 : vector<8x8xi1> to vector<8x8xi32>
    %6 = arith.sitofp %5 : vector<8x8xi32> to vector<8x8xf32>
    %cst = arith.constant dense<0.000000e+00> : vector<8x128xf32>
    %7 = tpu.matmul %6, %1, %cst {dimension_numbers = #tpu.dot_dimension_numbers<[1], [1], [0], [0], [0, 0, 1, 0], [], []>, precision = #tpu.contract_precision<fp32>} : vector<8x8xf32>, vector<128x8xf32>, vector<8x128xf32> -> vector<8x128xf32>
    %8 = tpu.iota {dimensions = array<i32: 1>} : vector<1x128xi32>
    %c0_2 = arith.constant 0 : index
    %c0_3 = arith.constant 0 : index
    %9 = vector.load %arg2[%c0_2, %c0_3] : memref<8x5xf32, #tpu.memory_space<vmem>>, vector<8x5xf32>
    %c0_4 = arith.constant 0 : index
    %c0_5 = arith.constant 0 : index
    %10 = vector.load %arg3[%c0_4, %c0_5] : memref<8x1xf32, #tpu.memory_space<vmem>>, vector<8x1xf32>
    %11 = vector.extract_strided_slice %9 {offsets = [0, 0], sizes = [8, 1], strides = [1, 1]} : vector<8x5xf32> to vector<8x1xf32>
    %c2_i32 = arith.constant 2 : i32
    %12 = tpu.dynamic_rotate %7 by %c2_i32 dim 1 : vector<8x128xf32>, i32 -> vector<8x128xf32>
    %c2_i32_6 = arith.constant 2 : i32
    %13 = vector.broadcast %c2_i32_6 : i32 to vector<1x128xi32>
    %14 = arith.cmpi sge, %8, %13 : vector<1x128xi32>
    %cst_7 = arith.constant 0.000000e+00 : f32
    %15 = vector.shape_cast %14 : vector<1x128xi1> to vector<1x128xi1>
    %16 = vector.broadcast %15 : vector<1x128xi1> to vector<8x128xi1>
    %17 = vector.broadcast %cst_7 : f32 to vector<8x128xf32>
    %18 = arith.select %16, %12, %17 : vector<8x128xi1>, vector<8x128xf32>
    %19 = vector.broadcast %11 : vector<8x1xf32> to vector<8x128xf32>
    %20 = arith.mulf %19, %18 : vector<8x128xf32>
    %21 = vector.extract_strided_slice %9 {offsets = [0, 1], sizes = [8, 1], strides = [1, 1]} : vector<8x5xf32> to vector<8x1xf32>
    %c1_i32 = arith.constant 1 : i32
    %22 = tpu.dynamic_rotate %7 by %c1_i32 dim 1 : vector<8x128xf32>, i32 -> vector<8x128xf32>
    %c1_i32_8 = arith.constant 1 : i32
    %23 = vector.broadcast %c1_i32_8 : i32 to vector<1x128xi32>
    %24 = arith.cmpi sge, %8, %23 : vector<1x128xi32>
    %cst_9 = arith.constant 0.000000e+00 : f32
    %25 = vector.shape_cast %24 : vector<1x128xi1> to vector<1x128xi1>
    %26 = vector.broadcast %25 : vector<1x128xi1> to vector<8x128xi1>
    %27 = vector.broadcast %cst_9 : f32 to vector<8x128xf32>
    %28 = arith.select %26, %22, %27 : vector<8x128xi1>, vector<8x128xf32>
    %29 = vector.broadcast %21 : vector<8x1xf32> to vector<8x128xf32>
    %30 = arith.mulf %29, %28 : vector<8x128xf32>
    %31 = arith.addf %20, %30 : vector<8x128xf32>
    %32 = vector.extract_strided_slice %9 {offsets = [0, 2], sizes = [8, 1], strides = [1, 1]} : vector<8x5xf32> to vector<8x1xf32>
    %33 = vector.broadcast %32 : vector<8x1xf32> to vector<8x128xf32>
    %34 = arith.mulf %33, %7 : vector<8x128xf32>
    %35 = arith.addf %31, %34 : vector<8x128xf32>
    %36 = vector.extract_strided_slice %9 {offsets = [0, 3], sizes = [8, 1], strides = [1, 1]} : vector<8x5xf32> to vector<8x1xf32>
    %c127_i32 = arith.constant 127 : i32
    %37 = tpu.dynamic_rotate %7 by %c127_i32 dim 1 : vector<8x128xf32>, i32 -> vector<8x128xf32>
    %c127_i32_10 = arith.constant 127 : i32
    %38 = vector.broadcast %c127_i32_10 : i32 to vector<1x128xi32>
    %39 = arith.cmpi slt, %8, %38 : vector<1x128xi32>
    %cst_11 = arith.constant 0.000000e+00 : f32
    %40 = vector.shape_cast %39 : vector<1x128xi1> to vector<1x128xi1>
    %41 = vector.broadcast %40 : vector<1x128xi1> to vector<8x128xi1>
    %42 = vector.broadcast %cst_11 : f32 to vector<8x128xf32>
    %43 = arith.select %41, %37, %42 : vector<8x128xi1>, vector<8x128xf32>
    %44 = vector.broadcast %36 : vector<8x1xf32> to vector<8x128xf32>
    %45 = arith.mulf %44, %43 : vector<8x128xf32>
    %46 = arith.addf %35, %45 : vector<8x128xf32>
    %47 = vector.extract_strided_slice %9 {offsets = [0, 4], sizes = [8, 1], strides = [1, 1]} : vector<8x5xf32> to vector<8x1xf32>
    %c126_i32 = arith.constant 126 : i32
    %48 = tpu.dynamic_rotate %7 by %c126_i32 dim 1 : vector<8x128xf32>, i32 -> vector<8x128xf32>
    %c126_i32_12 = arith.constant 126 : i32
    %49 = vector.broadcast %c126_i32_12 : i32 to vector<1x128xi32>
    %50 = arith.cmpi slt, %8, %49 : vector<1x128xi32>
    %cst_13 = arith.constant 0.000000e+00 : f32
    %51 = vector.shape_cast %50 : vector<1x128xi1> to vector<1x128xi1>
    %52 = vector.broadcast %51 : vector<1x128xi1> to vector<8x128xi1>
    %53 = vector.broadcast %cst_13 : f32 to vector<8x128xf32>
    %54 = arith.select %52, %48, %53 : vector<8x128xi1>, vector<8x128xf32>
    %55 = vector.broadcast %47 : vector<8x1xf32> to vector<8x128xf32>
    %56 = arith.mulf %55, %54 : vector<8x128xf32>
    %57 = arith.addf %46, %56 : vector<8x128xf32>
    %58 = vector.broadcast %10 : vector<8x1xf32> to vector<8x128xf32>
    %59 = arith.addf %57, %58 : vector<8x128xf32>
    %c0_14 = arith.constant 0 : index
    %c0_15 = arith.constant 0 : index
    %60 = vector.load %arg4[%c0_14, %c0_15] : memref<8x7xf32, #tpu.memory_space<vmem>>, vector<8x7xf32>
    %c0_16 = arith.constant 0 : index
    %c0_17 = arith.constant 0 : index
    %61 = vector.load %arg5[%c0_16, %c0_17] : memref<8x1xf32, #tpu.memory_space<vmem>>, vector<8x1xf32>
    %62 = vector.extract_strided_slice %60 {offsets = [0, 0], sizes = [8, 1], strides = [1, 1]} : vector<8x7xf32> to vector<8x1xf32>
    %c9_i32 = arith.constant 9 : i32
    %63 = tpu.dynamic_rotate %59 by %c9_i32 dim 1 : vector<8x128xf32>, i32 -> vector<8x128xf32>
    %c9_i32_18 = arith.constant 9 : i32
    %64 = vector.broadcast %c9_i32_18 : i32 to vector<1x128xi32>
    %65 = arith.cmpi sge, %8, %64 : vector<1x128xi32>
    %cst_19 = arith.constant 0.000000e+00 : f32
    %66 = vector.shape_cast %65 : vector<1x128xi1> to vector<1x128xi1>
    %67 = vector.broadcast %66 : vector<1x128xi1> to vector<8x128xi1>
    %68 = vector.broadcast %cst_19 : f32 to vector<8x128xf32>
    %69 = arith.select %67, %63, %68 : vector<8x128xi1>, vector<8x128xf32>
    %70 = vector.broadcast %62 : vector<8x1xf32> to vector<8x128xf32>
    %71 = arith.mulf %70, %69 : vector<8x128xf32>
    %72 = vector.extract_strided_slice %60 {offsets = [0, 1], sizes = [8, 1], strides = [1, 1]} : vector<8x7xf32> to vector<8x1xf32>
    %c6_i32 = arith.constant 6 : i32
    %73 = tpu.dynamic_rotate %59 by %c6_i32 dim 1 : vector<8x128xf32>, i32 -> vector<8x128xf32>
    %c6_i32_20 = arith.constant 6 : i32
    %74 = vector.broadcast %c6_i32_20 : i32 to vector<1x128xi32>
    %75 = arith.cmpi sge, %8, %74 : vector<1x128xi32>
    %cst_21 = arith.constant 0.000000e+00 : f32
    %76 = vector.shape_cast %75 : vector<1x128xi1> to vector<1x128xi1>
    %77 = vector.broadcast %76 : vector<1x128xi1> to vector<8x128xi1>
    %78 = vector.broadcast %cst_21 : f32 to vector<8x128xf32>
    %79 = arith.select %77, %73, %78 : vector<8x128xi1>, vector<8x128xf32>
    %80 = vector.broadcast %72 : vector<8x1xf32> to vector<8x128xf32>
    %81 = arith.mulf %80, %79 : vector<8x128xf32>
    %82 = arith.addf %71, %81 : vector<8x128xf32>
    %83 = vector.extract_strided_slice %60 {offsets = [0, 2], sizes = [8, 1], strides = [1, 1]} : vector<8x7xf32> to vector<8x1xf32>
    %c3_i32 = arith.constant 3 : i32
    %84 = tpu.dynamic_rotate %59 by %c3_i32 dim 1 : vector<8x128xf32>, i32 -> vector<8x128xf32>
    %c3_i32_22 = arith.constant 3 : i32
    %85 = vector.broadcast %c3_i32_22 : i32 to vector<1x128xi32>
    %86 = arith.cmpi sge, %8, %85 : vector<1x128xi32>
    %cst_23 = arith.constant 0.000000e+00 : f32
    %87 = vector.shape_cast %86 : vector<1x128xi1> to vector<1x128xi1>
    %88 = vector.broadcast %87 : vector<1x128xi1> to vector<8x128xi1>
    %89 = vector.broadcast %cst_23 : f32 to vector<8x128xf32>
    %90 = arith.select %88, %84, %89 : vector<8x128xi1>, vector<8x128xf32>
    %91 = vector.broadcast %83 : vector<8x1xf32> to vector<8x128xf32>
    %92 = arith.mulf %91, %90 : vector<8x128xf32>
    %93 = arith.addf %82, %92 : vector<8x128xf32>
    %94 = vector.extract_strided_slice %60 {offsets = [0, 3], sizes = [8, 1], strides = [1, 1]} : vector<8x7xf32> to vector<8x1xf32>
    %95 = vector.broadcast %94 : vector<8x1xf32> to vector<8x128xf32>
    %96 = arith.mulf %95, %59 : vector<8x128xf32>
    %97 = arith.addf %93, %96 : vector<8x128xf32>
    %98 = vector.extract_strided_slice %60 {offsets = [0, 4], sizes = [8, 1], strides = [1, 1]} : vector<8x7xf32> to vector<8x1xf32>
    %c125_i32 = arith.constant 125 : i32
    %99 = tpu.dynamic_rotate %59 by %c125_i32 dim 1 : vector<8x128xf32>, i32 -> vector<8x128xf32>
    %c125_i32_24 = arith.constant 125 : i32
    %100 = vector.broadcast %c125_i32_24 : i32 to vector<1x128xi32>
    %101 = arith.cmpi slt, %8, %100 : vector<1x128xi32>
    %cst_25 = arith.constant 0.000000e+00 : f32
    %102 = vector.shape_cast %101 : vector<1x128xi1> to vector<1x128xi1>
    %103 = vector.broadcast %102 : vector<1x128xi1> to vector<8x128xi1>
    %104 = vector.broadcast %cst_25 : f32 to vector<8x128xf32>
    %105 = arith.select %103, %99, %104 : vector<8x128xi1>, vector<8x128xf32>
    %106 = vector.broadcast %98 : vector<8x1xf32> to vector<8x128xf32>
    %107 = arith.mulf %106, %105 : vector<8x128xf32>
    %108 = arith.addf %97, %107 : vector<8x128xf32>
    %109 = vector.extract_strided_slice %60 {offsets = [0, 5], sizes = [8, 1], strides = [1, 1]} : vector<8x7xf32> to vector<8x1xf32>
    %c122_i32 = arith.constant 122 : i32
    %110 = tpu.dynamic_rotate %59 by %c122_i32 dim 1 : vector<8x128xf32>, i32 -> vector<8x128xf32>
    %c122_i32_26 = arith.constant 122 : i32
    %111 = vector.broadcast %c122_i32_26 : i32 to vector<1x128xi32>
    %112 = arith.cmpi slt, %8, %111 : vector<1x128xi32>
    %cst_27 = arith.constant 0.000000e+00 : f32
    %113 = vector.shape_cast %112 : vector<1x128xi1> to vector<1x128xi1>
    %114 = vector.broadcast %113 : vector<1x128xi1> to vector<8x128xi1>
    %115 = vector.broadcast %cst_27 : f32 to vector<8x128xf32>
    %116 = arith.select %114, %110, %115 : vector<8x128xi1>, vector<8x128xf32>
    %117 = vector.broadcast %109 : vector<8x1xf32> to vector<8x128xf32>
    %118 = arith.mulf %117, %116 : vector<8x128xf32>
    %119 = arith.addf %108, %118 : vector<8x128xf32>
    %120 = vector.extract_strided_slice %60 {offsets = [0, 6], sizes = [8, 1], strides = [1, 1]} : vector<8x7xf32> to vector<8x1xf32>
    %c119_i32 = arith.constant 119 : i32
    %121 = tpu.dynamic_rotate %59 by %c119_i32 dim 1 : vector<8x128xf32>, i32 -> vector<8x128xf32>
    %c119_i32_28 = arith.constant 119 : i32
    %122 = vector.broadcast %c119_i32_28 : i32 to vector<1x128xi32>
    %123 = arith.cmpi slt, %8, %122 : vector<1x128xi32>
    %cst_29 = arith.constant 0.000000e+00 : f32
    %124 = vector.shape_cast %123 : vector<1x128xi1> to vector<1x128xi1>
    %125 = vector.broadcast %124 : vector<1x128xi1> to vector<8x128xi1>
    %126 = vector.broadcast %cst_29 : f32 to vector<8x128xf32>
    %127 = arith.select %125, %121, %126 : vector<8x128xi1>, vector<8x128xf32>
    %128 = vector.broadcast %120 : vector<8x1xf32> to vector<8x128xf32>
    %129 = arith.mulf %128, %127 : vector<8x128xf32>
    %130 = arith.addf %119, %129 : vector<8x128xf32>
    %131 = vector.broadcast %61 : vector<8x1xf32> to vector<8x128xf32>
    %132 = arith.addf %130, %131 : vector<8x128xf32>
    %133 = tpu.concatenate %59, %132 in 0 : vector<8x128xf32>, vector<8x128xf32> -> vector<16x128xf32>
    %c0_30 = arith.constant 0 : index
    %c0_31 = arith.constant 0 : index
    %134 = vector.load %arg6[%c0_30, %c0_31] : memref<8x16xf32, #tpu.memory_space<vmem>>, vector<8x16xf32>
    %cst_32 = arith.constant dense<0.000000e+00> : vector<8x128xf32>
    %135 = tpu.matmul %134, %133, %cst_32 {dimension_numbers = #tpu.dot_dimension_numbers<[1], [0], [0], [1], [0, 0, 1, 1], [], []>} : vector<8x16xf32>, vector<16x128xf32>, vector<8x128xf32> -> vector<8x128xf32>
    %c0_33 = arith.constant 0 : index
    %c0_34 = arith.constant 0 : index
    %136 = vector.load %arg7[%c0_33, %c0_34] : memref<8x1xf32, #tpu.memory_space<vmem>>, vector<8x1xf32>
    %137 = vector.broadcast %136 : vector<8x1xf32> to vector<8x128xf32>
    %138 = arith.addf %135, %137 : vector<8x128xf32>
    %cst_35 = arith.constant dense<0.000000e+00> : vector<128xf32>
    %139 = vector.multi_reduction <add>, %138, %cst_35 [0] : vector<8x128xf32> to vector<128xf32>
    %140 = vector.shape_cast %139 : vector<128xf32> to vector<1x128xf32>
    %cst_36 = arith.constant 1.250000e-01 : f32
    %141 = vector.broadcast %cst_36 : f32 to vector<1x128xf32>
    %142 = arith.mulf %140, %141 : vector<1x128xf32>
    %cst_37 = arith.constant dense<0xFF800000> : vector<128xf32>
    %143 = vector.multi_reduction <maximumf>, %138, %cst_37 [0] : vector<8x128xf32> to vector<128xf32>
    %144 = vector.shape_cast %143 : vector<128xf32> to vector<1x128xf32>
    %145 = tpu.concatenate %142, %144 in 0 : vector<1x128xf32>, vector<1x128xf32> -> vector<2x128xf32>
    %c0_38 = arith.constant 0 : index
    %c0_39 = arith.constant 0 : index
    %c0_40 = arith.constant 0 : index
    %146 = vector.load %arg8[%c0_38, %c0_39, %c0_40] : memref<7x2x2xf32, #tpu.memory_space<vmem>>, vector<7x2x2xf32>
    %c3_i32_41 = arith.constant 3 : i32
    %147 = tpu.dynamic_rotate %145 by %c3_i32_41 dim 1 : vector<2x128xf32>, i32 -> vector<2x128xf32>
    %c3_i32_42 = arith.constant 3 : i32
    %148 = vector.broadcast %c3_i32_42 : i32 to vector<1x128xi32>
    %149 = arith.cmpi sge, %8, %148 : vector<1x128xi32>
    %cst_43 = arith.constant 0.000000e+00 : f32
    %150 = vector.shape_cast %149 : vector<1x128xi1> to vector<1x128xi1>
    %151 = vector.broadcast %150 : vector<1x128xi1> to vector<2x128xi1>
    %152 = vector.broadcast %cst_43 : f32 to vector<2x128xf32>
    %153 = arith.select %151, %147, %152 : vector<2x128xi1>, vector<2x128xf32>
    %154 = vector.extract_strided_slice %146 {offsets = [0, 0, 0], sizes = [1, 2, 1], strides = [1, 1, 1]} : vector<7x2x2xf32> to vector<1x2x1xf32>
    %155 = vector.shape_cast %154 : vector<1x2x1xf32> to vector<2x1xf32>
    %156 = vector.extract_strided_slice %153 {offsets = [0, 0], sizes = [1, 128], strides = [1, 1]} : vector<2x128xf32> to vector<1x128xf32>
    %157 = vector.broadcast %155 : vector<2x1xf32> to vector<2x128xf32>
    %158 = vector.broadcast %156 : vector<1x128xf32> to vector<2x128xf32>
    %159 = arith.mulf %157, %158 : vector<2x128xf32>
    %160 = vector.extract_strided_slice %146 {offsets = [0, 0, 1], sizes = [1, 2, 1], strides = [1, 1, 1]} : vector<7x2x2xf32> to vector<1x2x1xf32>
    %161 = vector.shape_cast %160 : vector<1x2x1xf32> to vector<2x1xf32>
    %162 = vector.extract_strided_slice %153 {offsets = [1, 0], sizes = [1, 128], strides = [1, 1]} : vector<2x128xf32> to vector<1x128xf32>
    %163 = vector.broadcast %161 : vector<2x1xf32> to vector<2x128xf32>
    %164 = vector.broadcast %162 : vector<1x128xf32> to vector<2x128xf32>
    %165 = arith.mulf %163, %164 : vector<2x128xf32>
    %166 = arith.addf %159, %165 : vector<2x128xf32>
    %c2_i32_44 = arith.constant 2 : i32
    %167 = tpu.dynamic_rotate %145 by %c2_i32_44 dim 1 : vector<2x128xf32>, i32 -> vector<2x128xf32>
    %c2_i32_45 = arith.constant 2 : i32
    %168 = vector.broadcast %c2_i32_45 : i32 to vector<1x128xi32>
    %169 = arith.cmpi sge, %8, %168 : vector<1x128xi32>
    %cst_46 = arith.constant 0.000000e+00 : f32
    %170 = vector.shape_cast %169 : vector<1x128xi1> to vector<1x128xi1>
    %171 = vector.broadcast %170 : vector<1x128xi1> to vector<2x128xi1>
    %172 = vector.broadcast %cst_46 : f32 to vector<2x128xf32>
    %173 = arith.select %171, %167, %172 : vector<2x128xi1>, vector<2x128xf32>
    %174 = vector.extract_strided_slice %146 {offsets = [1, 0, 0], sizes = [1, 2, 1], strides = [1, 1, 1]} : vector<7x2x2xf32> to vector<1x2x1xf32>
    %175 = vector.shape_cast %174 : vector<1x2x1xf32> to vector<2x1xf32>
    %176 = vector.extract_strided_slice %173 {offsets = [0, 0], sizes = [1, 128], strides = [1, 1]} : vector<2x128xf32> to vector<1x128xf32>
    %177 = vector.broadcast %175 : vector<2x1xf32> to vector<2x128xf32>
    %178 = vector.broadcast %176 : vector<1x128xf32> to vector<2x128xf32>
    %179 = arith.mulf %177, %178 : vector<2x128xf32>
    %180 = arith.addf %166, %179 : vector<2x128xf32>
    %181 = vector.extract_strided_slice %146 {offsets = [1, 0, 1], sizes = [1, 2, 1], strides = [1, 1, 1]} : vector<7x2x2xf32> to vector<1x2x1xf32>
    %182 = vector.shape_cast %181 : vector<1x2x1xf32> to vector<2x1xf32>
    %183 = vector.extract_strided_slice %173 {offsets = [1, 0], sizes = [1, 128], strides = [1, 1]} : vector<2x128xf32> to vector<1x128xf32>
    %184 = vector.broadcast %182 : vector<2x1xf32> to vector<2x128xf32>
    %185 = vector.broadcast %183 : vector<1x128xf32> to vector<2x128xf32>
    %186 = arith.mulf %184, %185 : vector<2x128xf32>
    %187 = arith.addf %180, %186 : vector<2x128xf32>
    %c1_i32_47 = arith.constant 1 : i32
    %188 = tpu.dynamic_rotate %145 by %c1_i32_47 dim 1 : vector<2x128xf32>, i32 -> vector<2x128xf32>
    %c1_i32_48 = arith.constant 1 : i32
    %189 = vector.broadcast %c1_i32_48 : i32 to vector<1x128xi32>
    %190 = arith.cmpi sge, %8, %189 : vector<1x128xi32>
    %cst_49 = arith.constant 0.000000e+00 : f32
    %191 = vector.shape_cast %190 : vector<1x128xi1> to vector<1x128xi1>
    %192 = vector.broadcast %191 : vector<1x128xi1> to vector<2x128xi1>
    %193 = vector.broadcast %cst_49 : f32 to vector<2x128xf32>
    %194 = arith.select %192, %188, %193 : vector<2x128xi1>, vector<2x128xf32>
    %195 = vector.extract_strided_slice %146 {offsets = [2, 0, 0], sizes = [1, 2, 1], strides = [1, 1, 1]} : vector<7x2x2xf32> to vector<1x2x1xf32>
    %196 = vector.shape_cast %195 : vector<1x2x1xf32> to vector<2x1xf32>
    %197 = vector.extract_strided_slice %194 {offsets = [0, 0], sizes = [1, 128], strides = [1, 1]} : vector<2x128xf32> to vector<1x128xf32>
    %198 = vector.broadcast %196 : vector<2x1xf32> to vector<2x128xf32>
    %199 = vector.broadcast %197 : vector<1x128xf32> to vector<2x128xf32>
    %200 = arith.mulf %198, %199 : vector<2x128xf32>
    %201 = arith.addf %187, %200 : vector<2x128xf32>
    %202 = vector.extract_strided_slice %146 {offsets = [2, 0, 1], sizes = [1, 2, 1], strides = [1, 1, 1]} : vector<7x2x2xf32> to vector<1x2x1xf32>
    %203 = vector.shape_cast %202 : vector<1x2x1xf32> to vector<2x1xf32>
    %204 = vector.extract_strided_slice %194 {offsets = [1, 0], sizes = [1, 128], strides = [1, 1]} : vector<2x128xf32> to vector<1x128xf32>
    %205 = vector.broadcast %203 : vector<2x1xf32> to vector<2x128xf32>
    %206 = vector.broadcast %204 : vector<1x128xf32> to vector<2x128xf32>
    %207 = arith.mulf %205, %206 : vector<2x128xf32>
    %208 = arith.addf %201, %207 : vector<2x128xf32>
    %209 = vector.extract_strided_slice %146 {offsets = [3, 0, 0], sizes = [1, 2, 1], strides = [1, 1, 1]} : vector<7x2x2xf32> to vector<1x2x1xf32>
    %210 = vector.shape_cast %209 : vector<1x2x1xf32> to vector<2x1xf32>
    %211 = vector.extract_strided_slice %145 {offsets = [0, 0], sizes = [1, 128], strides = [1, 1]} : vector<2x128xf32> to vector<1x128xf32>
    %212 = vector.broadcast %210 : vector<2x1xf32> to vector<2x128xf32>
    %213 = vector.broadcast %211 : vector<1x128xf32> to vector<2x128xf32>
    %214 = arith.mulf %212, %213 : vector<2x128xf32>
    %215 = arith.addf %208, %214 : vector<2x128xf32>
    %216 = vector.extract_strided_slice %146 {offsets = [3, 0, 1], sizes = [1, 2, 1], strides = [1, 1, 1]} : vector<7x2x2xf32> to vector<1x2x1xf32>
    %217 = vector.shape_cast %216 : vector<1x2x1xf32> to vector<2x1xf32>
    %218 = vector.extract_strided_slice %145 {offsets = [1, 0], sizes = [1, 128], strides = [1, 1]} : vector<2x128xf32> to vector<1x128xf32>
    %219 = vector.broadcast %217 : vector<2x1xf32> to vector<2x128xf32>
    %220 = vector.broadcast %218 : vector<1x128xf32> to vector<2x128xf32>
    %221 = arith.mulf %219, %220 : vector<2x128xf32>
    %222 = arith.addf %215, %221 : vector<2x128xf32>
    %c127_i32_50 = arith.constant 127 : i32
    %223 = tpu.dynamic_rotate %145 by %c127_i32_50 dim 1 : vector<2x128xf32>, i32 -> vector<2x128xf32>
    %c127_i32_51 = arith.constant 127 : i32
    %224 = vector.broadcast %c127_i32_51 : i32 to vector<1x128xi32>
    %225 = arith.cmpi slt, %8, %224 : vector<1x128xi32>
    %cst_52 = arith.constant 0.000000e+00 : f32
    %226 = vector.shape_cast %225 : vector<1x128xi1> to vector<1x128xi1>
    %227 = vector.broadcast %226 : vector<1x128xi1> to vector<2x128xi1>
    %228 = vector.broadcast %cst_52 : f32 to vector<2x128xf32>
    %229 = arith.select %227, %223, %228 : vector<2x128xi1>, vector<2x128xf32>
    %230 = vector.extract_strided_slice %146 {offsets = [4, 0, 0], sizes = [1, 2, 1], strides = [1, 1, 1]} : vector<7x2x2xf32> to vector<1x2x1xf32>
    %231 = vector.shape_cast %230 : vector<1x2x1xf32> to vector<2x1xf32>
    %232 = vector.extract_strided_slice %229 {offsets = [0, 0], sizes = [1, 128], strides = [1, 1]} : vector<2x128xf32> to vector<1x128xf32>
    %233 = vector.broadcast %231 : vector<2x1xf32> to vector<2x128xf32>
    %234 = vector.broadcast %232 : vector<1x128xf32> to vector<2x128xf32>
    %235 = arith.mulf %233, %234 : vector<2x128xf32>
    %236 = arith.addf %222, %235 : vector<2x128xf32>
    %237 = vector.extract_strided_slice %146 {offsets = [4, 0, 1], sizes = [1, 2, 1], strides = [1, 1, 1]} : vector<7x2x2xf32> to vector<1x2x1xf32>
    %238 = vector.shape_cast %237 : vector<1x2x1xf32> to vector<2x1xf32>
    %239 = vector.extract_strided_slice %229 {offsets = [1, 0], sizes = [1, 128], strides = [1, 1]} : vector<2x128xf32> to vector<1x128xf32>
    %240 = vector.broadcast %238 : vector<2x1xf32> to vector<2x128xf32>
    %241 = vector.broadcast %239 : vector<1x128xf32> to vector<2x128xf32>
    %242 = arith.mulf %240, %241 : vector<2x128xf32>
    %243 = arith.addf %236, %242 : vector<2x128xf32>
    %c126_i32_53 = arith.constant 126 : i32
    %244 = tpu.dynamic_rotate %145 by %c126_i32_53 dim 1 : vector<2x128xf32>, i32 -> vector<2x128xf32>
    %c126_i32_54 = arith.constant 126 : i32
    %245 = vector.broadcast %c126_i32_54 : i32 to vector<1x128xi32>
    %246 = arith.cmpi slt, %8, %245 : vector<1x128xi32>
    %cst_55 = arith.constant 0.000000e+00 : f32
    %247 = vector.shape_cast %246 : vector<1x128xi1> to vector<1x128xi1>
    %248 = vector.broadcast %247 : vector<1x128xi1> to vector<2x128xi1>
    %249 = vector.broadcast %cst_55 : f32 to vector<2x128xf32>
    %250 = arith.select %248, %244, %249 : vector<2x128xi1>, vector<2x128xf32>
    %251 = vector.extract_strided_slice %146 {offsets = [5, 0, 0], sizes = [1, 2, 1], strides = [1, 1, 1]} : vector<7x2x2xf32> to vector<1x2x1xf32>
    %252 = vector.shape_cast %251 : vector<1x2x1xf32> to vector<2x1xf32>
    %253 = vector.extract_strided_slice %250 {offsets = [0, 0], sizes = [1, 128], strides = [1, 1]} : vector<2x128xf32> to vector<1x128xf32>
    %254 = vector.broadcast %252 : vector<2x1xf32> to vector<2x128xf32>
    %255 = vector.broadcast %253 : vector<1x128xf32> to vector<2x128xf32>
    %256 = arith.mulf %254, %255 : vector<2x128xf32>
    %257 = arith.addf %243, %256 : vector<2x128xf32>
    %258 = vector.extract_strided_slice %146 {offsets = [5, 0, 1], sizes = [1, 2, 1], strides = [1, 1, 1]} : vector<7x2x2xf32> to vector<1x2x1xf32>
    %259 = vector.shape_cast %258 : vector<1x2x1xf32> to vector<2x1xf32>
    %260 = vector.extract_strided_slice %250 {offsets = [1, 0], sizes = [1, 128], strides = [1, 1]} : vector<2x128xf32> to vector<1x128xf32>
    %261 = vector.broadcast %259 : vector<2x1xf32> to vector<2x128xf32>
    %262 = vector.broadcast %260 : vector<1x128xf32> to vector<2x128xf32>
    %263 = arith.mulf %261, %262 : vector<2x128xf32>
    %264 = arith.addf %257, %263 : vector<2x128xf32>
    %c125_i32_56 = arith.constant 125 : i32
    %265 = tpu.dynamic_rotate %145 by %c125_i32_56 dim 1 : vector<2x128xf32>, i32 -> vector<2x128xf32>
    %c125_i32_57 = arith.constant 125 : i32
    %266 = vector.broadcast %c125_i32_57 : i32 to vector<1x128xi32>
    %267 = arith.cmpi slt, %8, %266 : vector<1x128xi32>
    %cst_58 = arith.constant 0.000000e+00 : f32
    %268 = vector.shape_cast %267 : vector<1x128xi1> to vector<1x128xi1>
    %269 = vector.broadcast %268 : vector<1x128xi1> to vector<2x128xi1>
    %270 = vector.broadcast %cst_58 : f32 to vector<2x128xf32>
    %271 = arith.select %269, %265, %270 : vector<2x128xi1>, vector<2x128xf32>
    %272 = vector.extract_strided_slice %146 {offsets = [6, 0, 0], sizes = [1, 2, 1], strides = [1, 1, 1]} : vector<7x2x2xf32> to vector<1x2x1xf32>
    %273 = vector.shape_cast %272 : vector<1x2x1xf32> to vector<2x1xf32>
    %274 = vector.extract_strided_slice %271 {offsets = [0, 0], sizes = [1, 128], strides = [1, 1]} : vector<2x128xf32> to vector<1x128xf32>
    %275 = vector.broadcast %273 : vector<2x1xf32> to vector<2x128xf32>
    %276 = vector.broadcast %274 : vector<1x128xf32> to vector<2x128xf32>
    %277 = arith.mulf %275, %276 : vector<2x128xf32>
    %278 = arith.addf %264, %277 : vector<2x128xf32>
    %279 = vector.extract_strided_slice %146 {offsets = [6, 0, 1], sizes = [1, 2, 1], strides = [1, 1, 1]} : vector<7x2x2xf32> to vector<1x2x1xf32>
    %280 = vector.shape_cast %279 : vector<1x2x1xf32> to vector<2x1xf32>
    %281 = vector.extract_strided_slice %271 {offsets = [1, 0], sizes = [1, 128], strides = [1, 1]} : vector<2x128xf32> to vector<1x128xf32>
    %282 = vector.broadcast %280 : vector<2x1xf32> to vector<2x128xf32>
    %283 = vector.broadcast %281 : vector<1x128xf32> to vector<2x128xf32>
    %284 = arith.mulf %282, %283 : vector<2x128xf32>
    %285 = arith.addf %278, %284 : vector<2x128xf32>
    %c0_59 = arith.constant 0 : index
    %c0_60 = arith.constant 0 : index
    %286 = vector.load %arg9[%c0_59, %c0_60] : memref<2x1xf32, #tpu.memory_space<vmem>>, vector<2x1xf32>
    %287 = vector.broadcast %286 : vector<2x1xf32> to vector<2x128xf32>
    %288 = arith.addf %285, %287 : vector<2x128xf32>
    %289 = arith.negf %288 : vector<2x128xf32>
    %290 = math.exp %289 : vector<2x128xf32>
    %cst_61 = arith.constant 1.000000e+00 : f32
    %291 = vector.broadcast %cst_61 : f32 to vector<2x128xf32>
    %292 = arith.addf %291, %290 : vector<2x128xf32>
    %293 = arith.divf %291, %292 : vector<2x128xf32>
    %294 = tpu.iota {dimensions = array<i32: 0>} : vector<8x1xi32>
    %c4_i32 = arith.constant 4 : i32
    %295 = vector.broadcast %c4_i32 : i32 to vector<8x1xi32>
    %296 = arith.cmpi slt, %294, %295 : vector<8x1xi32>
    %297 = vector.extract_strided_slice %293 {offsets = [0, 0], sizes = [1, 128], strides = [1, 1]} : vector<2x128xf32> to vector<1x128xf32>
    %298 = vector.extract_strided_slice %293 {offsets = [1, 0], sizes = [1, 128], strides = [1, 1]} : vector<2x128xf32> to vector<1x128xf32>
    %299 = vector.shape_cast %296 : vector<8x1xi1> to vector<8x1xi1>
    %300 = vector.broadcast %299 : vector<8x1xi1> to vector<8x128xi1>
    %301 = vector.shape_cast %297 : vector<1x128xf32> to vector<1x128xf32>
    %302 = vector.broadcast %301 : vector<1x128xf32> to vector<8x128xf32>
    %303 = vector.shape_cast %298 : vector<1x128xf32> to vector<1x128xf32>
    %304 = vector.broadcast %303 : vector<1x128xf32> to vector<8x128xf32>
    %305 = arith.select %300, %302, %304 : vector<8x128xi1>, vector<8x128xf32>
    %c0_62 = arith.constant 0 : index
    %c0_63 = arith.constant 0 : index
    %306 = vector.load %arg10[%c0_62, %c0_63] : memref<8x8xf32, #tpu.memory_space<vmem>>, vector<8x8xf32>
    %307 = arith.mulf %138, %305 : vector<8x128xf32>
    %cst_64 = arith.constant dense<0.000000e+00> : vector<8x128xf32>
    %308 = tpu.matmul %306, %307, %cst_64 {dimension_numbers = #tpu.dot_dimension_numbers<[1], [0], [0], [1], [0, 0, 1, 1], [], []>} : vector<8x8xf32>, vector<8x128xf32>, vector<8x128xf32> -> vector<8x128xf32>
    %c0_65 = arith.constant 0 : index
    %c0_66 = arith.constant 0 : index
    %309 = vector.load %arg11[%c0_65, %c0_66] : memref<8x1xf32, #tpu.memory_space<vmem>>, vector<8x1xf32>
    %310 = vector.broadcast %309 : vector<8x1xf32> to vector<8x128xf32>
    %311 = arith.addf %308, %310 : vector<8x128xf32>
    %cst_67 = arith.constant dense<0.000000e+00> : vector<128x8xf32>
    %312 = tpu.matmul %311, %6, %cst_67 {dimension_numbers = #tpu.dot_dimension_numbers<[0], [0], [1], [1], [0, 1, 1, 1], [], []>, precision = #tpu.contract_precision<fp32>} : vector<8x128xf32>, vector<8x8xf32>, vector<128x8xf32> -> vector<128x8xf32>
    %313 = arith.mulf %1, %312 : vector<128x8xf32>
    %c0_68 = arith.constant 0 : index
    %c0_69 = arith.constant 0 : index
    %c0_70 = arith.constant 0 : index
    %314 = vector.load %arg12[%c0_68, %c0_69, %c0_70] : memref<1x128x8xf32, #tpu.memory_space<vmem>>, vector<1x128x8xf32>
    %315 = vector.shape_cast %314 : vector<1x128x8xf32> to vector<128x8xf32>
    %316 = vector.shape_cast %313 : vector<128x8xf32> to vector<1x128x8xf32>
    tpu.vector_store %arg12[%c0_68, %c0_69, %c0_70], %316 {strides = array<i32>} : memref<1x128x8xf32, #tpu.memory_space<vmem>>, vector<1x128x8xf32>,
    return
  }
  func.func @transform_0(%arg0: i32) -> (i32, i32, i32) {
    %c0_i32 = arith.constant 0 : i32
    %c0_i32_0 = arith.constant 0 : i32
    %c0_i32_1 = arith.constant 0 : i32
    return %arg0, %c0_i32, %c0_i32_0 : i32, i32, i32
  }
  func.func @transform_1(%arg0: i32) -> (i32, i32) {
    %c0_i32 = arith.constant 0 : i32
    %c0_i32_0 = arith.constant 0 : i32
    %c0_i32_1 = arith.constant 0 : i32
    return %c0_i32, %c0_i32_0 : i32, i32
  }
  func.func @transform_2(%arg0: i32) -> (i32, i32) {
    %c0_i32 = arith.constant 0 : i32
    %c0_i32_0 = arith.constant 0 : i32
    %c0_i32_1 = arith.constant 0 : i32
    return %c0_i32, %c0_i32_0 : i32, i32
  }
  func.func @transform_3(%arg0: i32) -> (i32, i32) {
    %c0_i32 = arith.constant 0 : i32
    %c0_i32_0 = arith.constant 0 : i32
    %c0_i32_1 = arith.constant 0 : i32
    return %c0_i32, %c0_i32_0 : i32, i32
  }
  func.func @transform_4(%arg0: i32) -> (i32, i32) {
    %c0_i32 = arith.constant 0 : i32
    %c0_i32_0 = arith.constant 0 : i32
    %c0_i32_1 = arith.constant 0 : i32
    return %c0_i32, %c0_i32_0 : i32, i32
  }
  func.func @transform_5(%arg0: i32) -> (i32, i32) {
    %c0_i32 = arith.constant 0 : i32
    %c0_i32_0 = arith.constant 0 : i32
    %c0_i32_1 = arith.constant 0 : i32
    return %c0_i32, %c0_i32_0 : i32, i32
  }
  func.func @transform_6(%arg0: i32) -> (i32, i32) {
    %c0_i32 = arith.constant 0 : i32
    %c0_i32_0 = arith.constant 0 : i32
    %c0_i32_1 = arith.constant 0 : i32
    return %c0_i32, %c0_i32_0 : i32, i32
  }
  func.func @transform_7(%arg0: i32) -> (i32, i32, i32) {
    %c0_i32 = arith.constant 0 : i32
    %c0_i32_0 = arith.constant 0 : i32
    %c0_i32_1 = arith.constant 0 : i32
    %c0_i32_2 = arith.constant 0 : i32
    return %c0_i32, %c0_i32_0, %c0_i32_1 : i32, i32, i32
  }
  func.func @transform_8(%arg0: i32) -> (i32, i32) {
    %c0_i32 = arith.constant 0 : i32
    %c0_i32_0 = arith.constant 0 : i32
    %c0_i32_1 = arith.constant 0 : i32
    return %c0_i32, %c0_i32_0 : i32, i32
  }
  func.func @transform_9(%arg0: i32) -> (i32, i32) {
    %c0_i32 = arith.constant 0 : i32
    %c0_i32_0 = arith.constant 0 : i32
    %c0_i32_1 = arith.constant 0 : i32
    return %c0_i32, %c0_i32_0 : i32, i32
  }
  func.func @transform_10(%arg0: i32) -> (i32, i32) {
    %c0_i32 = arith.constant 0 : i32
    %c0_i32_0 = arith.constant 0 : i32
    %c0_i32_1 = arith.constant 0 : i32
    return %c0_i32, %c0_i32_0 : i32, i32
  }
  func.func @transform_11(%arg0: i32) -> (i32, i32, i32) {
    %c0_i32 = arith.constant 0 : i32
    %c0_i32_0 = arith.constant 0 : i32
    %c0_i32_1 = arith.constant 0 : i32
    return %arg0, %c0_i32, %c0_i32_0 : i32, i32, i32
  }
}

</mosaic_0001>

<bundles_post_ra>
// kernel: lsk_block_1d.1
= control target key start
LH: loop header
LB: loop body
LE: loop exit
PB: predicated region body
PF: predicated region fallthrough
CT: control target
= control target key end

     0   :  { %s3887_s17 = smov 0   ;;  %s4851_s0 = inlined_call_operand.vmem [shape: f32[2,128,8], index: 0, kind: input, shape index: {}]   ;;  %s4852_s1 = inlined_call_operand.vmem [shape: f32[8,5], index: 1, kind: input, shape index: {}]   ;;  %s4853_s2 = inlined_call_operand.vmem [shape: f32[8,1], index: 2, kind: input, shape index: {}]   ;;  %s4854_s3 = inlined_call_operand.vmem [shape: f32[8,7], index: 3, kind: input, shape index: {}]   ;;  %s4855_s4 = inlined_call_operand.vmem [shape: f32[8,1], index: 4, kind: input, shape index: {}]   ;;  %s4856_s5 = inlined_call_operand.vmem [shape: f32[8,16], index: 5, kind: input, shape index: {}]   ;;  %s4857_s6 = inlined_call_operand.vmem [shape: f32[8,1], index: 6, kind: input, shape index: {}]   ;;  %s4858_s7 = inlined_call_operand.vmem [shape: f32[7,2,2], index: 7, kind: input, shape index: {}]   ;;  %s4859_s8 = inlined_call_operand.vmem [shape: f32[2,1], index: 8, kind: input, shape index: {}]   ;;  %s4860_s9 = inlined_call_operand.vmem [shape: f32[8,8], index: 9, kind: input, shape index: {}]   ;;  %s4861_s10 = inlined_call_operand.vmem [shape: f32[8,1], index: 10, kind: input, shape index: {}]   ;;  %s4862_s11 = inlined_call_operand.vmem [shape: f32[2,128,8], index: 11, kind: output, shape index: {}]  }
   0x1 LB: > { %s2882_s18 = sadd.s32 4294967295, %s3804_s17   ;;  %p2886_p0 = scmp.ge.s32.totalorder %s3804_s17, 1  ;;  %s3804_s17 = sphi %s3887_s17, %s21_s17  }
   0x2   : > { %p337_p1 = scmp.lt.s32.totalorder %s3804_s17, 3 }
   0x4   : > { %p338_p2 = pnand %p2886_p0, %p337_p1 }
   0x5   : > { %p377_p3 = scmp.lt.s32.totalorder (!%p338_p2), %s2882_s18, 1  ;;  %v3806_v0 = vmov (!%p338_p2), 0.0|0.0   ;;  %vm3807_vm0 = vmmov (!%p338_p2), 0   ;;  %v3808_v1 = vmov (!%p338_p2), 0.0   ;;  %vm410_vm1 = vcmask (!%p338_p2), 64512   ;;  %s3814_s25 = smov (!%p338_p2), 1  }
   0x6   : > { %341 = sbr.rel (%p338_p2) target bundleno = 2058 (0x80a), region = 64  ;;  %3516 = vmatprep.subr.bf16.mxu0 (!%p338_p2), %v3806_v0  ;;  %3181 = vmatprep.mubr.msk.f32.mxu0 (!%p338_p2), %vm3807_vm0, %v3808_v1  ;;  %s3815_s26 = smov (!%p338_p2), 2   ;;  %vm1258_vm13 = vcmask (!%p338_p2), 130048   ;;  %vm1345_vm14 = vcmask (!%p338_p2), 1040384  }
   0x7   : > { %3492 = vmatprep.subr.bf16.mxu1 (!%p338_p2), %v3806_v0  ;;  %3146 = vmatprep.mubr.msk.f32.mxu1 (!%p338_p2), %vm3807_vm0, %v3808_v1  ;;  %s3816_s29 = smov (!%p338_p2), 127   ;;  %s3817_s13 = smov (!%p338_p2), 126  }
   0x8   : > { %s3820_s28 = smov (!%p338_p2), 9   ;;  %s3821_s30 = smov (!%p338_p2), 6  }
   0x9   : > { %s3822_s12 = smov (!%p338_p2), 3   ;;  %s3823_s14 = smov (!%p338_p2), 125  }
   0xa   : > { %s3824_s15 = smov (!%p338_p2), 122   ;;  %s3825_s21 = smov (!%p338_p2), 119  }
   0xd   : > { %s4885_s18 = smov (!%p377_p3, %s2882_s18), 1 }
   0xe   : > { %s2903_s19 = sshll.u32 %s4885_s18, 7 }
   0xf   : > { %s3909_s22 = scalar_lea.vmem %s4851_s0, %s2903_s19 }
  0x10   : > { %v387_v2 = vld [vmem:[%s3909_s22] sm:$0xff]  ;;  %v388_v3 = vld [vmem:[%s3909_s22 + $0x8] sm:$0xff]  ;;  %v389_v4 = vld [vmem:[%s3909_s22 + $0x10] sm:$0xff] }
  0x11   : > { %v3915_v5 = vsel %vm410_vm1, %v387_v2, 0  ;;  %v3918_v6 = vsel %vm410_vm1, %v388_v3, 0  ;;  %v390_v7 = vld [vmem:[%s3909_s22 + $0x18] sm:$0xff]  ;;  %v3922_v8 = vsel %vm410_vm1, %v389_v4, 0  ;;  %v391_v9 = vld [vmem:[%s3909_s22 + $0x20] sm:$0xff]  ;;  %v392_v10 = vld [vmem:[%s3909_s22 + $0x28] sm:$0xff] }
  0x12   : > { %v463_v11 = vand.u32 4294901760, %v3915_v5  ;;  %v466_v12 = vand.u32 4294901760, %v3918_v6  ;;  %v3929_v13 = vsel %vm410_vm1, %v390_v7, 0  ;;  %v469_v14 = vand.u32 4294901760, %v3922_v8  ;;  %v393_v15 = vld [vmem:[%s3909_s22 + $0x30] sm:$0xff]  ;;  %v394_v19 = vld [vmem:[%s3909_s22 + $0x38] sm:$0xff] }
  0x13   : > { %v472_v16 = vand.u32 4294901760, %v3929_v13  ;;  %v3935_v17 = vsel %vm410_vm1, %v391_v9, 0  ;;  %v3938_v18 = vsel %vm410_vm1, %v392_v10, 0  ;;  %v3964_v26 = vsel %vm410_vm1, %v393_v15, 0  ;;  %v395_v49 = vld [vmem:[%s3909_s22 + $0x40] sm:$0xff]  ;;  %v396_v50 = vld [vmem:[%s3909_s22 + $0x48] sm:$0xff] }
  0x14   : > { %v3944_v20 = vsub.f32 %v3915_v5, %v463_v11  ;;  %v3949_v21 = vsub.f32 %v3918_v6, %v466_v12  ;;  %v3954_v22 = vsub.f32 %v3922_v8, %v469_v14  ;;  %v475_v23 = vand.u32 4294901760, %v3935_v17  ;;  %v397_v51 = vld [vmem:[%s3909_s22 + $0x50] sm:$0xff]  ;;  %v398_v54 = vld [vmem:[%s3909_s22 + $0x58] sm:$0xff]  ;;  %v399_v55 = vld [vmem:[%s3909_s22 + $0x60] sm:$0xff] }
  0x15   : > { %v3960_v24 = vsub.f32 %v3929_v13, %v472_v16  ;;  %v478_v25 = vand.u32 4294901760, %v3938_v18  ;;  %v3970_v30 = vsel %vm410_vm1, %v394_v19, 0  ;;  %v481_v36 = vand.u32 4294901760, %v3964_v26  ;;  %v400_v56 = vld [vmem:[%s3909_s22 + $0x68] sm:$0xff]  ;;  %v401_v58 = vld [vmem:[%s3909_s22 + $0x70] sm:$0xff]  ;;  %v402_v59 = vld [vmem:[%s3909_s22 + $0x78] sm:$0xff] }
  0x16   : > { %v4870_v27 = vand.u32 4294901760, %v3944_v20  ;;  %v4869_v28 = vand.u32 4294901760, %v3949_v21  ;;  %v4868_v29 = vand.u32 4294901760, %v3954_v22  ;;  %v3976_v32 = vsub.f32 %v3935_v17, %v475_v23 }
  0x17   : > { %v4867_v31 = vand.u32 4294901760, %v3960_v24  ;;  %v3981_v33 = vsub.f32 %v3938_v18, %v478_v25  ;;  %v484_v37 = vand.u32 4294901760, %v3970_v30  ;;  %v4002_v45 = vsub.f32 %v3964_v26, %v481_v36 }
  0x18   : > { %v557_v34 = vsub.f32 %v3944_v20, %v4870_v27  ;;  %v564_v35 = vsub.f32 %v3949_v21, %v4869_v28  ;;  %v571_v40 = vsub.f32 %v3954_v22, %v4868_v29  ;;  %v4866_v42 = vand.u32 4294901760, %v3976_v32 }
  0x19   : > { %v578_v41 = vsub.f32 %v3960_v24, %v4867_v31  ;;  %v4865_v43 = vand.u32 4294901760, %v3981_v33  ;;  %v4007_v46 = vsub.f32 %v3970_v30, %v484_v37  ;;  %v4864_v57 = vand.u32 4294901760, %v4002_v45 }
  0x1a   : > { %v558_v38 = vand.u32 4294901760, %v557_v34  ;;  %v565_v39 = vand.u32 4294901760, %v564_v35  ;;  %v572_v47 = vand.u32 4294901760, %v571_v40  ;;  %v585_v52 = vsub.f32 %v3976_v32, %v4866_v42 }
  0x1b   : > { %v579_v48 = vand.u32 4294901760, %v578_v41  ;;  %v592_v53 = vsub.f32 %v3981_v33, %v4865_v43  ;;  %v4863_v60 = vand.u32 4294901760, %v4007_v46  ;;  %v4027_v61 = vsel %vm410_vm1, %v395_v49, 0 }
  0x1c   : > { %v3517_v44 = vpack.c.bf16 %v565_v39, %v558_v38  ;;  %v4030_v62 = vsel %vm410_vm1, %v396_v50, 0  ;;  %v4033_v63 = vsel %vm410_vm1, %v397_v51, 0  ;;  %v4036_v3 = vsel %vm410_vm1, %v398_v54, 0 }
  0x1d   : > { %v3520_v2 = vpack.c.bf16 %v579_v48, %v572_v47  ;;  %v4039_v4 = vsel %vm410_vm1, %v399_v55, 0  ;;  %v4042_v7 = vsel %vm410_vm1, %v400_v56, 0  ;;  %v586_v9 = vand.u32 4294901760, %v585_v52 }
  0x1e   : > { %3518 = vmatpush3.bf16.xpose.msra.mxu0 %v3517_v44  ;;  %v593_v10 = vand.u32 4294901760, %v592_v53  ;;  %v4045_v15 = vsel %vm410_vm1, %v401_v58, 0  ;;  %v4048_v19 = vsel %vm410_vm1, %v402_v59, 0  ;;  %v487_v34 = vand.u32 4294901760, %v4027_v61 }
  0x1f   : > { %3519 = vmatprep.subr.bf16.mxu0 %v3806_v0  ;;  %v490_v35 = vand.u32 4294901760, %v4030_v62  ;;  %v493_v38 = vand.u32 4294901760, %v4033_v63  ;;  %v496_v39 = vand.u32 4294901760, %v4036_v3  ;;  %v499_v40 = vand.u32 4294901760, %v4039_v4 }
  0x20   : > { %v502_v41 = vand.u32 4294901760, %v4042_v7  ;;  %v505_v44 = vand.u32 4294901760, %v4045_v15  ;;  %v508_v47 = vand.u32 4294901760, %v4048_v19  ;;  %v3523_v48 = vpack.c.bf16 %v593_v10, %v586_v9 }
  0x21   : > { %v599_v49 = vsub.f32 %v4002_v45, %v4864_v57  ;;  %v606_v50 = vsub.f32 %v4007_v46, %v4863_v60  ;;  %v4068_v51 = vsub.f32 %v4027_v61, %v487_v34  ;;  %v4073_v52 = vsub.f32 %v4030_v62, %v490_v35 }
  0x22   : > { %v4078_v53 = vsub.f32 %v4033_v63, %v493_v38  ;;  %v3541_v54 = vpack.c.bf16 %v3949_v21, %v3944_v20  ;;  %v4085_v55 = vsub.f32 %v4036_v3, %v496_v39  ;;  %v4090_v56 = vsub.f32 %v4039_v4, %v499_v40 }
  0x23   : > { %v4095_v58 = vsub.f32 %v4042_v7, %v502_v41  ;;  %v3544_v59 = vpack.c.bf16 %v3960_v24, %v3954_v22  ;;  %v4107_v9 = vsub.f32 %v4048_v19, %v508_v47  ;;  %v3547_v10 = vpack.c.bf16 %v3981_v33, %v3976_v32 }
  0x24   : > { %v3556_v43 = vpack.c.bf16 %v4085_v55, %v4078_v53  ;;  %v4125_v29 = vpack.c.bf16 %v466_v12, %v463_v11  ;;  %v600_v28 = vand.u32 4294901760, %v599_v49  ;;  %v607_v27 = vand.u32 4294901760, %v606_v50 }
  0x25   : > { %v3559_v42 = vpack.c.bf16 %v4095_v58, %v4090_v56  ;;  %v612_v57 = vand.u32 4294901760, %v4068_v51  ;;  %v619_v60 = vand.u32 4294901760, %v4073_v52  ;;  %v4142_v11 = vpack.c.bf16 %v472_v16, %v469_v14 }
  0x26   : > { %3521 = vmatpush3.bf16.xpose.msra.mxu0 %v3520_v2  ;;  %v4102_v2 = vsub.f32 %v4045_v15, %v505_v44  ;;  %3494 = vmatpush3.bf16.xpose.msra.mxu1 %v4125_v29  ;;  %v3526_v31 = vpack.c.bf16 %v607_v27, %v600_v28  ;;  %v626_v49 = vand.u32 4294901760, %v4078_v53  ;;  %v633_v27 = vand.u32 4294901760, %v4085_v55 }
  0x27   : > { %3522 = vmatprep.subr.bf16.mxu0 %v3806_v0  ;;  %3495 = vmatprep.subr.bf16.mxu1 %v3806_v0  ;;  %v613_v5 = vsub.f32 %v4068_v51, %v612_v57  ;;  %v620_v6 = vsub.f32 %v4073_v52, %v619_v60  ;;  %v4159_v14 = vpack.c.bf16 %v478_v25, %v475_v23  ;;  %v640_v50 = vand.u32 4294901760, %v4090_v56 }
  0x28   : > { %v627_v8 = vsub.f32 %v4078_v53, %v626_v49  ;;  %v634_v13 = vsub.f32 %v4085_v55, %v633_v27  ;;  %v4176_v23 = vpack.c.bf16 %v484_v37, %v481_v36  ;;  %v4193_v36 = vpack.c.bf16 %v490_v35, %v487_v34  ;;  %v1165_v53 = vld [vmem:[%s4854_s3] sm:$0xff] }
  0x29   : > { %v614_v12 = vand.u32 4294901760, %v613_v5  ;;  %v647_v5 = vand.u32 4294901760, %v4095_v58  ;;  %v641_v17 = vsub.f32 %v4090_v56, %v640_v50  ;;  %v4206_v61 = vpack.c.bf16 %v496_v39, %v493_v38 }
  0x2a   : > { %v628_v16 = vand.u32 4294901760, %v627_v8  ;;  %v4228_v3 = vpack.c.bf16 %v502_v41, %v499_v40  ;;  %v4242_v4 = vpack.c.bf16 %v508_v47, %v505_v44  ;;  %v4873_v7 = vpack.c.bf16 %v4007_v46, %v4002_v45  ;;  %v1103_v44 = vld [vmem:[%s4852_s1] sm:$0xff] }
  0x2b   : > { %v648_v18 = vsub.f32 %v4095_v58, %v647_v5  ;;  %v642_v25 = vand.u32 4294901760, %v641_v17  ;;  %v4874_v15 = vpack.c.bf16 %v4073_v52, %v4068_v51  ;;  %v4875_v19 = vpack.c.bf16 %v4107_v9, %v4102_v2  ;;  %v1166_v58 = vld [vmem:[%s4855_s4] sm:$0xff] }
  0x2c   : > { %v4876_v39 = vand.u32 4294901760, %v3944_v20  ;;  %v4877_v40 = vand.u32 4294901760, %v3949_v21  ;;  %v3809_v47 = vmov 2   ;;  %v3810_v20 = vmov 0  }
  0x2d   : > { %3759 = vset.pattern.permute.xlu1 %v3809_v47  ;;  %3757 = vset.pattern.permute.xlu0 %v3810_v20  ;;  %v4878_v21 = vand.u32 4294901760, %v3954_v22  ;;  %v4881_v22 = vand.u32 4294901760, %v3981_v33  ;;  %v3604_v33 = vpack.c.bf16 %v633_v27, %v626_v49  ;;  %v3818_v55 = vmov 5  }
  0x2e   : > { %3524 = vmatpush3.bf16.xpose.msra.mxu0 %v3523_v48  ;;  %v621_v48 = vand.u32 4294901760, %v620_v6  ;;  %3497 = vmatpush3.bf16.xpose.msra.mxu1 %v4142_v11  ;;  %v3589_v41 = vpack.c.bf16 %v4877_v40, %v4876_v39  ;;  %v3819_v56 = vmov 6   ;;  %v1349_v39 = vld [vmem:[%s4858_s7 + $0x4] sm:$0x3] }
  0x2f   : > { %3525 = vmatprep.subr.bf16.mxu0 %v3806_v0  ;;  %3498 = vmatprep.subr.bf16.mxu1 %v3806_v0  ;;  %v1252_v40 = vld [vmem:[%s4857_s6] sm:$0xff] }
  0x30   : > { %v3529_v28 = vpack.c.bf16 %v621_v48, %v614_v12  ;;  %v649_v12 = vand.u32 4294901760, %v648_v18  ;;  %v654_v48 = vand.u32 4294901760, %v4102_v2  ;;  %1130 = vperm.xlu1 %3759, %v1103_v44   ;;  %1113 = vperm.xlu0 %3757, %v1103_v44   ;;  %v3812_v18 = vmov 1  }
  0x32   : > { %v3535_v8 = vpack.c.bf16 %v649_v12, %v642_v25  ;;  %v655_v26 = vsub.f32 %v4102_v2, %v654_v48  ;;  %v3813_v25 = vmov 4   ;;  %v4880_v12 = vand.u32 4294901760, %v3976_v32  ;;  %v1347_v2 = vld [vmem:[%s4858_s7] sm:$0x3] }
  0x33   : > { %v3601_v32 = vpack.c.bf16 %v619_v60, %v612_v57 }
  0x34   : > { %v656_v37 = vand.u32 4294901760, %v655_v26  ;;  %3758 = vset.pattern.permute.xlu0 %v3812_v18  ;;  %v4883_v26 = vand.u32 4294901760, %v4007_v46 }
  0x35   : > { %1124 = vperm.xlu0 %3758, %v1103_v44  }
  0x36   : > { %3527 = vmatpush3.bf16.xpose.msra.mxu0 %v3526_v31  ;;  %v635_v31 = vand.u32 4294901760, %v634_v13  ;;  %3500 = vmatpush3.bf16.xpose.msra.mxu1 %v4159_v14 }
  0x37   : > { %3528 = vmatprep.subr.bf16.mxu0 %v3806_v0  ;;  %3501 = vmatprep.subr.bf16.mxu1 %v3806_v0 }
  0x38   : > { %v3532_v6 = vpack.c.bf16 %v635_v31, %v628_v16  ;;  %v403_v16 = vlaneseq }
  0x3a   : > { %v4200_v17 = vand.u32 127, %v403_v16 }
  0x3c   : > { %vm1119_vm3 = vcmp.ge.s32.totalorder %v4200_v17, 1  ;;  %vm1107_vm4 = vcmp.ge.s32.totalorder %v4200_v17, 2  ;;  %vm1137_vm5 = vcmp.lt.s32.totalorder %v4200_v17, 127  ;;  %vm1149_vm6 = vcmp.lt.s32.totalorder %v4200_v17, 126 }
  0x3d   : > { %vm1169_vm7 = vcmp.ge.s32.totalorder %v4200_v17, 9  ;;  %vm1181_vm8 = vcmp.ge.s32.totalorder %v4200_v17, 6  ;;  %vm1193_vm9 = vcmp.ge.s32.totalorder %v4200_v17, 3  ;;  %vm1211_vm10 = vcmp.lt.s32.totalorder %v4200_v17, 125 }
  0x3e   : > { %3530 = vmatpush3.bf16.xpose.msra.mxu0 %v3529_v28  ;;  %v661_v28 = vand.u32 4294901760, %v4107_v9  ;;  %3503 = vmatpush3.bf16.xpose.msra.mxu1 %v4176_v23  ;;  %vm1223_vm11 = vcmp.lt.s32.totalorder %v4200_v17, 122  ;;  %vm1235_vm12 = vcmp.lt.s32.totalorder %v4200_v17, 119 }
  0x3f   : > { %3531 = vmatprep.subr.bf16.mxu0 %v3806_v0  ;;  %3504 = vmatprep.subr.bf16.mxu1 %v3806_v0 }
  0x40   : > { %v662_v30 = vsub.f32 %v4107_v9, %v661_v28  ;;  %v3610_v46 = vpack.c.bf16 %v661_v28, %v654_v48  ;;  %v1348_v9 = vld [vmem:[%s4858_s7 + $0x2] sm:$0x3] }
  0x42   : > { %v663_v13 = vand.u32 4294901760, %v662_v30 }
  0x44   : > { %v3538_v31 = vpack.c.bf16 %v663_v13, %v656_v37 }
  0x46   : > { %3533 = vmatpush3.bf16.xpose.msra.mxu0 %v3532_v6  ;;  %3506 = vmatpush3.bf16.xpose.msra.mxu1 %v4193_v36  ;;  %v4198_v6 = vshrl.u32 %v403_v16, 7 }
  0x47   : > { %3534 = vmatprep.subr.bf16.mxu0 %v3806_v0  ;;  %3507 = vmatprep.subr.bf16.mxu1 %v3806_v0 }
  0x48   : > { %vm4211_vm2 = vcmp.eq.s32.totalorder %v4198_v6, %v4200_v17  ;;  %vm1531_vm15 = vcmp.lt.s32.totalorder %v4198_v6, 4 }
  0x49   : > { %v4220_v63 = vsel %vm4211_vm2, 1.0, %v3808_v1 }
  0x4a   : > { %v412_v34 = vsel %vm410_vm1, %v4220_v63, 0 }
  0x4b   : > { %v544_v35 = vsub.f32 %v412_v34, %v412_v34 }
  0x4e   : > { %3536 = vmatpush3.bf16.xpose.msra.mxu0 %v3535_v8  ;;  %3509 = vmatpush3.bf16.xpose.msra.mxu1 %v4206_v61  ;;  %v4882_v8 = vand.u32 4294901760, %v4002_v45  ;;  %v3607_v45 = vpack.c.bf16 %v647_v5, %v640_v50 }
  0x4f   : > { %3537 = vmatprep.subr.bf16.mxu0 %v3806_v0  ;;  %3510 = vmatprep.subr.bf16.mxu1 %v3806_v0 }
  0x50   : > { %v3598_v30 = vpack.c.bf16 %v4883_v26, %v4882_v8 }
  0x56   : > { %3539 = vmatpush3.bf16.xpose.msra.mxu0 %v3538_v31  ;;  %3512 = vmatpush3.bf16.xpose.msra.mxu1 %v4228_v3 }
  0x57   : > { %3540 = vmatprep.subr.bf16.mxu0 %v3806_v0  ;;  %3513 = vmatprep.subr.bf16.mxu1 %v3806_v0 }
  0x5d   : > { %3182 = vmatmul.mubr.msk.f32.vlgmr.msra.gmra.mrb[0].mxu0 %vm410_vm1, %v4220_v63 }
  0x5e   : > { %3542 = vmatpush3.bf16.xpose.msra.mxu0 %v3541_v54  ;;  %3216 = vmatprep.mubr.msk.f32.mxu0 %vm3807_vm0, %v3808_v1  ;;  %v4879_v54 = vand.u32 4294901760, %v3960_v24  ;;  %v3595_v24 = vpack.c.bf16 %v4881_v22, %v4880_v12 }
  0x5f   : > { %3543 = vmatprep.subr.bf16.mxu0 %v3806_v0  ;;  %3515 = vmatpush3.bf16.xpose.msra.mxu1 %v4242_v4 }
  0x60   : > { %3636 = vmatprep.subr.bf16.mxu1 %v3806_v0 }
  0x66   : > { %3545 = vmatpush3.bf16.xpose.msra.mxu0 %v3544_v59  ;;  %v3592_v59 = vpack.c.bf16 %v4879_v54, %v4878_v21 }
  0x67   : > { %3546 = vmatprep.subr.bf16.mxu0 %v3806_v0 }
  0x6e   : > { %3548 = vmatpush3.bf16.xpose.msra.mxu0 %v3547_v10  ;;  %v3811_v10 = vmov 3  }
  0x6f   : > { %3549 = vmatprep.subr.bf16.mxu0 %v3806_v0  ;;  %3760 = vset.pattern.permute.xlu1 %v3811_v10 }
  0x70   : > { %1142 = vperm.xlu1 %3760, %v1103_v44  }
  0x74   : > { %3761 = vset.pattern.permute.xlu1 %v3813_v25 }
  0x75   : > { %1154 = vperm.xlu1 %3761, %v1103_v44  }
  0x76   : > { %3551 = vmatpush3.bf16.xpose.msra.mxu0 %v4873_v7 }
  0x77   : > { %3552 = vmatprep.subr.bf16.mxu0 %v3806_v0 }
  0x79   : > { %3762 = vset.pattern.permute.xlu1 %v3810_v20 }
  0x7e   : > { %3554 = vmatpush3.bf16.xpose.msra.mxu0 %v4874_v15 }
  0x7f   : > { %3555 = vmatprep.subr.bf16.mxu0 %v3806_v0 }
  0x86   : > { %3557 = vmatpush3.bf16.xpose.msra.mxu0 %v3556_v43 }
  0x87   : > { %3558 = vmatprep.subr.bf16.mxu0 %v3806_v0 }
  0x8e   : > { %3560 = vmatpush3.bf16.xpose.msra.mxu0 %v3559_v42  ;;  %v545_v42 = vand.u32 4294901760, %v544_v35 }
  0x8f   : > { %3561 = vmatprep.subr.bf16.mxu0 %v3806_v0 }
  0x90   : > { %v546_v43 = vsub.f32 %v544_v35, %v545_v42 }
  0x92   : > { %v547_v38 = vand.u32 4294901760, %v546_v43 }
  0x94   : > { %3147 = vmatmul.mubr.f32.vlgmr.msra.gmra.mrb[0].mxu1 %v547_v38 }
  0x95   : > { %3328 = vmatprep.mubr.msk.f32.mxu1 %vm3807_vm0, %v3808_v1 }
  0x96   : > { %3563 = vmatpush3.bf16.xpose.msra.mxu0 %v4875_v19 }
  0x97   : > { %3564 = vmatprep.subr.bf16.mxu0 %v3806_v0 }
  0x9d   : > { %3217 = vmatmul.mubr.f32.vlgmr.msra.gmra.mrb[0].mxu0 %v544_v35 }
  0x9e   : > { %3566 = vmatpush3.bf16.xpose.msra.mxu0 %v4125_v29  ;;  %3251 = vmatprep.mubr.msk.f32.mxu0 %vm3807_vm0, %v3808_v1 }
  0x9f   : > { %3567 = vmatprep.subr.bf16.mxu0 %v3806_v0 }
  0xa6   : > { %3569 = vmatpush3.bf16.xpose.msra.mxu0 %v4142_v11 }
  0xa7   : > { %3570 = vmatprep.subr.bf16.mxu0 %v3806_v0 }
  0xae   : > { %3572 = vmatpush3.bf16.xpose.msra.mxu0 %v4159_v14 }
  0xaf   : > { %3573 = vmatprep.subr.bf16.mxu0 %v3806_v0  ;;  %v1131_v49 = vpop.permute.xlu1 %1130 }
  0xb6   : > { %3575 = vmatpush3.bf16.xpose.msra.mxu0 %v4176_v23 }
  0xb7   : > { %3576 = vmatprep.subr.bf16.mxu0 %v3806_v0 }
  0xbe   : > { %3578 = vmatpush3.bf16.xpose.msra.mxu0 %v4193_v36 }
  0xbf   : > { %3579 = vmatprep.subr.bf16.mxu0 %v3806_v0 }
  0xc6   : > { %3581 = vmatpush3.bf16.xpose.msra.mxu0 %v4206_v61 }
  0xc7   : > { %3582 = vmatprep.subr.bf16.mxu0 %v3806_v0 }
  0xce   : > { %3584 = vmatpush3.bf16.xpose.msra.mxu0 %v4228_v3 }
  0xcf   : > { %3585 = vmatprep.subr.bf16.mxu0 %v3806_v0 }
  0xd6   : > { %3587 = vmatpush3.bf16.xpose.msra.mxu0 %v4242_v4 }
  0xd7   : > { %3588 = vmatprep.subr.bf16.mxu0 %v3806_v0 }
  0xdd   : > { %3252 = vmatmul.mubr.f32.vlgmr.msra.gmra.mrb[0].mxu0 %v545_v42 }
  0xde   : > { %3590 = vmatpush3.bf16.xpose.msra.mxu0 %v3589_v41  ;;  %3286 = vmatprep.mubr.msk.f32.mxu0 %vm3807_vm0, %v3808_v1  ;;  %v1351_v41 = vld [vmem:[%s4858_s7 + $0x8] sm:$0x3] }
  0xdf   : > { %3591 = vmatprep.subr.bf16.mxu0 %v3806_v0 }
  0xe6   : > { %3593 = vmatpush3.bf16.xpose.msra.mxu0 %v3592_v59 }
  0xe7   : > { %3594 = vmatprep.subr.bf16.mxu0 %v3806_v0 }
  0xee   : > { %3596 = vmatpush3.bf16.xpose.msra.mxu0 %v3595_v24 }
  0xef   : > { %3597 = vmatprep.subr.bf16.mxu0 %v3806_v0  ;;  %v1143_v27 = vpop.permute.xlu1 %1142 }
  0xf4   : > { %v1155_v50 = vpop.permute.xlu1 %1154 }
  0xf6   : > { %3599 = vmatpush3.bf16.xpose.msra.mxu0 %v3598_v30 }
  0xf7   : > { %3600 = vmatprep.subr.bf16.mxu0 %v3806_v0 }
  0xfe   : > { %3602 = vmatpush3.bf16.xpose.msra.mxu0 %v3601_v32 }
  0xff   : > { %3603 = vmatprep.subr.bf16.mxu0 %v3806_v0 }
 0x106   : > { %3605 = vmatpush3.bf16.xpose.msra.mxu0 %v3604_v33 }
 0x107   : > { %3606 = vmatprep.subr.bf16.mxu0 %v3806_v0 }
 0x10e   : > { %3608 = vmatpush3.bf16.xpose.msra.mxu0 %v3607_v45 }
 0x10f   : > { %3609 = vmatprep.subr.bf16.mxu0 %v3806_v0 }
 0x116   : > { %3611 = vmatpush3.bf16.xpose.msra.mxu0 %v3610_v46 }
 0x117   : > { %3612 = vmatprep.subr.bf16.mxu0 %v3806_v0 }
 0x11d   : > { %3287 = vmatmul.mubr.msk.f32.vlgmr.msra.gmra.mrb[0].mxu0 %vm410_vm1, %v4220_v63 }
 0x11e   : > { %3614 = vmatpush3.bf16.xpose.msra.mxu0 %v4125_v29  ;;  %3321 = vmatprep.mubr.msk.f32.mxu0 %vm3807_vm0, %v3808_v1 }
 0x11f   : > { %3615 = vmatprep.subr.bf16.mxu0 %v3806_v0 }
 0x126   : > { %3617 = vmatpush3.bf16.xpose.msra.mxu0 %v4142_v11  ;;  %v1350_v11 = vld [vmem:[%s4858_s7 + $0x6] sm:$0x3] }
 0x127   : > { %3618 = vmatprep.subr.bf16.mxu0 %v3806_v0 }
 0x12e   : > { %3620 = vmatpush3.bf16.xpose.msra.mxu0 %v4159_v14  ;;  %v1114_v14 = vpop.permute.xlu0 %1113 }
 0x12f   : > { %3621 = vmatprep.subr.bf16.mxu0 %v3806_v0 }
 0x132   : > { %v1125_v5 = vpop.permute.xlu0 %1124 }
 0x136   : > { %3623 = vmatpush3.bf16.xpose.msra.mxu0 %v4176_v23 }
 0x137   : > { %3624 = vmatprep.subr.bf16.mxu0 %v3806_v0 }
 0x13e   : > { %3626 = vmatpush3.bf16.xpose.msra.mxu0 %v4193_v36 }
 0x13f   : > { %3627 = vmatprep.subr.bf16.mxu0 %v3806_v0 }
 0x146   : > { %3629 = vmatpush3.bf16.xpose.msra.mxu0 %v4206_v61 }
 0x147   : > { %3630 = vmatprep.subr.bf16.mxu0 %v3806_v0 }
 0x14e   : > { %3632 = vmatpush3.bf16.xpose.msra.mxu0 %v4228_v3 }
 0x14f   : > { %3633 = vmatprep.subr.bf16.mxu0 %v3806_v0  ;;  %v1104_v0 = vld [vmem:[%s4853_s2] sm:$0xff] }
 0x156   : > { %3635 = vmatpush3.bf16.xpose.msra.mxu0 %v4242_v4 }
 0x15d   : > { %3322 = vmatmul.mubr.msk.f32.vlgmr.msra.gmra.mrb[0].mxu0 %vm410_vm1, %v4220_v63 }
 0x167   : > { %v549_v29 = vpop.f32.mrb[0].mxu1 }
 0x168   : > { %v3148_v57 = vpop.f32.mrb[1].mxu1 }
 0x230   : > { %v1099_v60 = vpop.f32.mrb[0].mxu0 }
 0x231   : > { %v3639_v51 = vadd.f32 %v1099_v60, %v549_v29  ;;  %v3323_v52 = vpop.f32.mrb[1].mxu0 }
 0x233   : > { %1117 = vrot.lane.b32.xlu0 %v3639_v51, %s3814_s25  ;;  %1105 = vrot.lane.b32.xlu1 %v3639_v51, %s3815_s26  ;;  %v1133_v3 = vmul.f32 %v3639_v51, %v1131_v49 }
 0x237   : > { %1135 = vrot.lane.b32.xlu0 %v3639_v51, %s3816_s29  ;;  %1161 = vperm.xlu1 %3762, %v1104_v0  }
 0x23b   : > { %1147 = vrot.lane.b32.xlu0 %v3639_v51, %s3817_s13  ;;  %1175 = vperm.xlu1 %3762, %v1165_v53  }
 0x23f   : > { %1186 = vperm.xlu0 %3758, %v1165_v53   ;;  %3763 = vset.pattern.permute.xlu1 %v3809_v47 }
 0x240   : > { %1198 = vperm.xlu1 %3763, %v1165_v53  }
 0x243   : > { %3764 = vset.pattern.permute.xlu0 %v3811_v10 }
 0x244   : > { %1204 = vperm.xlu0 %3764, %v1165_v53   ;;  %3766 = vset.pattern.permute.xlu1 %v3818_v55 }
 0x245   : > { %1228 = vperm.xlu1 %3766, %v1165_v53  }
 0x248   : > { %3765 = vset.pattern.permute.xlu0 %v3813_v25 }
 0x249   : > { %1216 = vperm.xlu0 %3765, %v1165_v53   ;;  %3769 = vset.pattern.permute.xlu1 %v3810_v20 }
 0x24d   : > { %3767 = vset.pattern.permute.xlu0 %v3819_v56 }
 0x24e   : > { %1240 = vperm.xlu0 %3767, %v1165_v53  }
 0x252   : > { %3768 = vset.pattern.permute.xlu0 %v3810_v20 }
 0x253   : > { %1247 = vperm.xlu0 %3768, %v1166_v58  }
 0x257   : > { %1359 = vperm.xlu0 %3768, %v1347_v2  }
 0x25b   : > { %1382 = vperm.xlu0 %3768, %v1348_v9  }
 0x25f   : > { %1427 = vperm.xlu0 %3768, %v1350_v11  }
 0x263   : > { %3772 = vset.pattern.permute.xlu0 %v3812_v18 }
 0x264   : > { %1392 = vperm.xlu0 %3772, %v1348_v9  }
 0x268   : > { %1416 = vperm.xlu0 %3772, %v1349_v39  }
 0x26c   : > { %1461 = vperm.xlu0 %3772, %v1351_v41  }
 0x2a5   : > { %v1118_v23 = vpop.permute.xlu0 %1117  ;;  %v1106_v48 = vpop.permute.xlu1 %1105 }
 0x2a6   : > { %v1122_v28 = vsel %vm1119_vm3, %v1118_v23, 0.0  ;;  %v1110_v36 = vsel %vm1107_vm4, %v1106_v48, 0.0  ;;  %v1251_v23 = vld [vmem:[%s4856_s5] sm:$0xff]  ;;  %v1352_v48 = vld [vmem:[%s4858_s7 + $0xa] sm:$0x3] }
 0x2a7   : > { %v1127_v37 = vmul.f32 %v1125_v5, %v1122_v28  ;;  %v1116_v13 = vmul.f32 %v1114_v14, %v1110_v36  ;;  %1485 = vperm.xlu0 %3772, %v1352_v48   ;;  %v1353_v28 = vld [vmem:[%s4858_s7 + $0xc] sm:$0x3]  ;;  %v1518_v36 = vld [vmem:[%s4859_s8] sm:$0x3] }
 0x2a9   : > { %v1136_v16 = vpop.permute.xlu0 %1135  ;;  %v1128_v31 = vadd.f32 %v1127_v37, %v1116_v13 }
 0x2aa   : > { %v1140_v61 = vsel %vm1137_vm5, %v1136_v16, 0.0 }
 0x2ab   : > { %v1134_v15 = vadd.f32 %v1133_v3, %v1128_v31  ;;  %v1145_v19 = vmul.f32 %v1143_v27, %v1140_v61  ;;  %3775 = vset.pattern.permute.xlu0 %v3810_v20 }
 0x2ac   : > { %1499 = vperm.xlu0 %3775, %v1353_v28  }
 0x2ad   : > { %v1148_v4 = vpop.permute.xlu0 %1147  ;;  %v1146_v35 = vadd.f32 %v1145_v19, %v1134_v15 }
 0x2ae   : > { %v1152_v7 = vsel %vm1149_vm6, %v1148_v4, 0.0 }
 0x2af   : > { %v1157_v34 = vmul.f32 %v1155_v50, %v1152_v7 }
 0x2b0   : > { %1521 = vperm.xlu0 %3775, %v1518_v36  }
 0x2b1   : > { %v1158_v42 = vadd.f32 %v1157_v34, %v1146_v35 }
 0x2b6   : > { %v1162_v43 = vpop.permute.xlu1 %1161 }
 0x2b7   : > { %v4408_v38 = vadd.f32 %v1162_v43, %v1158_v42 }
 0x2b9   : > { %1167 = vrot.lane.b32.xlu1 %v4408_v38, %s3820_s28 }
 0x2ba   : > { %v1176_v44 = vpop.permute.xlu1 %1175 }
 0x2bd   : > { %1179 = vrot.lane.b32.xlu1 %v4408_v38, %s3821_s30 }
 0x2be   : > { %v1187_v59 = vpop.permute.xlu0 %1186 }
 0x2bf   : > { %v1199_v47 = vpop.permute.xlu1 %1198 }
 0x2c1   : > { %1191 = vrot.lane.b32.xlu1 %v4408_v38, %s3822_s12 }
 0x2c3   : > { %v1205_v26 = vpop.permute.xlu0 %1204 }
 0x2c4   : > { %v1229_v21 = vpop.permute.xlu1 %1228  ;;  %v1207_v60 = vmul.f32 %v1205_v26, %v4408_v38 }
 0x2c5   : > { %1209 = vrot.lane.b32.xlu1 %v4408_v38, %s3823_s14 }
 0x2c8   : > { %v1217_v29 = vpop.permute.xlu0 %1216 }
 0x2c9   : > { %1221 = vrot.lane.b32.xlu1 %v4408_v38, %s3824_s15 }
 0x2cd   : > { %1233 = vrot.lane.b32.xlu1 %v4408_v38, %s3825_s21  ;;  %v1241_v56 = vpop.permute.xlu0 %1240 }
 0x2d1   : > { %1255 = vperm.xlu1 %3769, %v1252_v40  }
 0x2d2   : > { %v1248_v14 = vpop.permute.xlu0 %1247 }
 0x2d5   : > { %3770 = vset.pattern.permute.xlu1 %v3812_v18 }
 0x2d6   : > { %1368 = vperm.xlu1 %3770, %v1347_v2  }
 0x2da   : > { %3771 = vset.pattern.permute.xlu1 %v3810_v20 }
 0x2db   : > { %1406 = vperm.xlu1 %3771, %v1349_v39   ;;  %v1545_v39 = vld [vmem:[%s4861_s10] sm:$0xff] }
 0x2df   : > { %3773 = vset.pattern.permute.xlu1 %v3812_v18 }
 0x2e0   : > { %1437 = vperm.xlu1 %3773, %v1350_v11  }
 0x2e4   : > { %3774 = vset.pattern.permute.xlu1 %v3810_v20 }
 0x2e5   : > { %1451 = vperm.xlu1 %3774, %v1351_v41  }
 0x2e9   : > { %1475 = vperm.xlu1 %3774, %v1352_v48  }
 0x2ed   : > { %3776 = vset.pattern.permute.xlu1 %v3812_v18 }
 0x32b   : > { %v1168_v54 = vpop.permute.xlu1 %1167 }
 0x32c   : > { %v1172_v25 = vsel %vm1169_vm7, %v1168_v54, 0.0  ;;  %v1360_v54 = vpop.permute.xlu0 %1359 }
 0x32d   : > { %v1178_v24 = vmul.f32 %v1176_v44, %v1172_v25 }
 0x32f   : > { %v1180_v10 = vpop.permute.xlu1 %1179 }
 0x330   : > { %v1184_v12 = vsel %vm1181_vm8, %v1180_v10, 0.0  ;;  %v4476_v10 = vsub.s32 1, %v4198_v6 }
 0x331   : > { %v1189_v22 = vmul.f32 %v1187_v59, %v1184_v12  ;;  %v1383_v12 = vpop.permute.xlu0 %1382 }
 0x333   : > { %v1192_v8 = vpop.permute.xlu1 %1191  ;;  %v1190_v32 = vadd.f32 %v1189_v22, %v1178_v24 }
 0x334   : > { %v1196_v30 = vsel %vm1193_vm9, %v1192_v8, 0.0 }
 0x335   : > { %v1201_v33 = vmul.f32 %v1199_v47, %v1196_v30 }
 0x337   : > { %v1202_v45 = vadd.f32 %v1201_v33, %v1190_v32  ;;  %v1210_v46 = vpop.permute.xlu1 %1209 }
 0x338   : > { %v1214_v57 = vsel %vm1211_vm10, %v1210_v46, 0.0 }
 0x339   : > { %v1208_v51 = vadd.f32 %v1207_v60, %v1202_v45  ;;  %v1219_v52 = vmul.f32 %v1217_v29, %v1214_v57  ;;  %v1428_v45 = vpop.permute.xlu0 %1427 }
 0x33b   : > { %v1222_v0 = vpop.permute.xlu1 %1221  ;;  %v1220_v58 = vadd.f32 %v1219_v52, %v1208_v51 }
 0x33c   : > { %v1226_v53 = vsel %vm1223_vm11, %v1222_v0, 0.0 }
 0x33d   : > { %v1231_v55 = vmul.f32 %v1229_v21, %v1226_v53  ;;  %v1393_v52 = vpop.permute.xlu0 %1392 }
 0x33f   : > { %v1234_v2 = vpop.permute.xlu1 %1233  ;;  %v1232_v11 = vadd.f32 %v1231_v55, %v1220_v58 }
 0x340   : > { %v1238_v9 = vsel %vm1235_vm12, %v1234_v2, 0.0 }
 0x341   : > { %v1243_v49 = vmul.f32 %v1241_v56, %v1238_v9  ;;  %v1417_v9 = vpop.permute.xlu0 %1416 }
 0x343   : > { %v1244_v27 = vadd.f32 %v1243_v49, %v1232_v11 }
 0x345   : > { %v1250_v50 = vadd.f32 %v1248_v14, %v1244_v27  ;;  %v1462_v36 = vpop.permute.xlu0 %1461 }
 0x347   : > { %v3637_v5 = vpack.c.bf16 %v1250_v50, %v4408_v38 }
 0x349   : > { %3638 = vmatpush3.bf16.msra.mxu1 %v3637_v5 }
 0x34a   : > { %3331 = vmatprep.subr.mxu1 %v3808_v1 }
 0x34c   : > { %3329 = vmatmul.mubr.msk.f32.vlgmr.msra.gmra.mrb[2].mxu1 %vm1258_vm13, %v1251_v23 }
 0x34d   : > { %3333 = vmatprep.mubr.msk.f32.mxu1 %vm3807_vm0, %v3808_v1 }
 0x350   : > { %v1256_v1 = vpop.permute.xlu1 %1255 }
 0x355   : > { %v1369_v40 = vpop.permute.xlu1 %1368 }
 0x35a   : > { %v1407_v41 = vpop.permute.xlu1 %1406 }
 0x35f   : > { %v1438_v44 = vpop.permute.xlu1 %1437 }
 0x364   : > { %v1452_v47 = vpop.permute.xlu1 %1451 }
 0x368   : > { %v1476_v21 = vpop.permute.xlu1 %1475 }
 0x41f   : > { %v1328_v37 = vpop.f32.mrb[2].mxu1 }
 0x420   : > { %v4460_v13 = vadd.f32 %v1328_v37, %v1256_v1  ;;  %v3330_v16 = vpop.f32.mrb[3].mxu1 }
 0x422   : > { %v1332_v31 = vrot.slane %v4460_v13, 4 }
 0x424   : > { %v1333_v18 = vadd.f32 %v1332_v31, %v4460_v13  ;;  %v1340_v61 = vmax.f32 %v4460_v13, %v1332_v31 }
 0x426   : > { %v1334_v3 = vrot.slane %v1333_v18, 2  ;;  %v1341_v4 = vrot.slane %v1340_v61, 2 }
 0x428   : > { %v1335_v7 = vadd.f32 %v1334_v3, %v1333_v18  ;;  %v1342_v15 = vmax.f32 %v1340_v61, %v1341_v4 }
 0x42a   : > { %v1336_v19 = vrot.slane %v1335_v7, 1  ;;  %v1343_v34 = vrot.slane %v1342_v15, 1 }
 0x42c   : > { %v1337_v35 = vadd.f32 %v1336_v19, %v1335_v7  ;;  %v1344_v43 = vmax.f32 %v1342_v15, %v1343_v34 }
 0x42e   : > { %v1338_v42 = vmul.f32 0.125, %v1337_v35  ;;  %v1486_v35 = vpop.permute.xlu0 %1485 }
 0x430   : > { %v1346_v38 = vsel %vm1345_vm14, %v1338_v42, %v1344_v43 }
 0x431   : > { %1354 = vrot.lane.b32.xlu1 %v1346_v38, %s3822_s12  ;;  %v1443_v5 = vrot.slane %v1346_v38, %v4476_v10  ;;  %s4798_s12 = scalar_lea.vmem %s4862_s11, %s2903_s19 }
 0x433   : > { %v1444_v37 = vmul.f32 %v1443_v5, %v1438_v44 }
 0x435   : > { %1377 = vrot.lane.b32.xlu1 %v1346_v38, %s3815_s26 }
 0x439   : > { %1401 = vrot.lane.b32.xlu1 %v1346_v38, %s3814_s25 }
 0x43d   : > { %1509 = vperm.xlu1 %3776, %v1353_v28  }
 0x441   : > { %1446 = vrot.lane.b32.xlu1 %v1346_v38, %s3816_s29 }
 0x442   : > { %3777 = vset.pattern.permute.xlu1 %v3810_v20  ;;  %v4479_v20 = vsub.s32 0, %v4198_v6  ;;  %v3826_v6 = vmov 1.0  }
 0x444   : > { %v1433_v27 = vrot.slane %v1346_v38, %v4479_v20 }
 0x445   : > { %1470 = vrot.lane.b32.xlu1 %v1346_v38, %s3817_s13 }
 0x446   : > { %v1434_v23 = vmul.f32 %v1433_v27, %v1428_v45 }
 0x449   : > { %1494 = vrot.lane.b32.xlu1 %v1346_v38, %s3823_s14 }
 0x44d   : > { %1548 = vperm.xlu1 %3777, %v1545_v39  }
 0x4a3   : > { %v1355_v59 = vpop.permute.xlu1 %1354 }
 0x4a4   : > { %v1356_v25 = vsel %vm1193_vm9, %v1355_v59, 0.0 }
 0x4a5   : > { %v1365_v22 = vrot.slane %v1356_v25, %v4479_v20  ;;  %v1374_v24 = vrot.slane %v1356_v25, %v4476_v10 }
 0x4a7   : > { %v1378_v8 = vpop.permute.xlu1 %1377  ;;  %v1366_v32 = vmul.f32 %v1365_v22, %v1360_v54  ;;  %v1375_v33 = vmul.f32 %v1374_v24, %v1369_v40  ;;  %v1500_v54 = vpop.permute.xlu0 %1499 }
 0x4a8   : > { %v1379_v26 = vsel %vm1107_vm4, %v1378_v8, 0.0 }
 0x4a9   : > { %v1388_v30 = vrot.slane %v1379_v26, %v4479_v20  ;;  %v1376_v60 = vadd.f32 %v1375_v33, %v1366_v32  ;;  %v1398_v51 = vrot.slane %v1379_v26, %v4476_v10 }
 0x4ab   : > { %v1402_v46 = vpop.permute.xlu1 %1401  ;;  %v1389_v29 = vmul.f32 %v1388_v30, %v1383_v12  ;;  %v1399_v55 = vmul.f32 %v1398_v51, %v1393_v52  ;;  %v1522_v8 = vpop.permute.xlu0 %1521 }
 0x4ac   : > { %v1403_v57 = vsel %vm1119_vm3, %v1402_v46, 0.0 }
 0x4ad   : > { %v1390_v0 = vadd.f32 %v1389_v29, %v1376_v60  ;;  %v1412_v53 = vrot.slane %v1403_v57, %v4479_v20  ;;  %v1422_v2 = vrot.slane %v1403_v57, %v4476_v10  ;;  %v1543_v57 = vld [vmem:[%s4860_s9] sm:$0xff] }
 0x4af   : > { %v1400_v56 = vadd.f32 %v1399_v55, %v1390_v0  ;;  %v1413_v58 = vmul.f32 %v1412_v53, %v1407_v41  ;;  %v1423_v49 = vmul.f32 %v1422_v2, %v1417_v9 }
 0x4b1   : > { %v1414_v11 = vadd.f32 %v1413_v58, %v1400_v56 }
 0x4b3   : > { %v1424_v14 = vadd.f32 %v1423_v49, %v1414_v11 }
 0x4b5   : > { %v1435_v48 = vadd.f32 %v1434_v23, %v1424_v14 }
 0x4b7   : > { %v1445_v18 = vadd.f32 %v1444_v37, %v1435_v48 }
 0x4bc   : > { %v1510_v50 = vpop.permute.xlu1 %1509 }
 0x4c0   : > { %v1447_v28 = vpop.permute.xlu1 %1446 }
 0x4c1   : > { %v1448_v1 = vsel %vm1137_vm5, %v1447_v28, 0.0 }
 0x4c2   : > { %v1457_v16 = vrot.slane %v1448_v1, %v4479_v20  ;;  %v1467_v31 = vrot.slane %v1448_v1, %v4476_v10 }
 0x4c4   : > { %v1458_v61 = vmul.f32 %v1457_v16, %v1452_v47  ;;  %v1471_v3 = vpop.permute.xlu1 %1470  ;;  %v1468_v15 = vmul.f32 %v1467_v31, %v1462_v36 }
 0x4c5   : > { %v1472_v4 = vsel %vm1149_vm6, %v1471_v3, 0.0 }
 0x4c6   : > { %v1459_v7 = vadd.f32 %v1458_v61, %v1445_v18  ;;  %v1481_v19 = vrot.slane %v1472_v4, %v4479_v20  ;;  %v1491_v34 = vrot.slane %v1472_v4, %v4476_v10 }
 0x4c8   : > { %v1469_v42 = vadd.f32 %v1468_v15, %v1459_v7  ;;  %v1482_v43 = vmul.f32 %v1481_v19, %v1476_v21  ;;  %v1495_v38 = vpop.permute.xlu1 %1494  ;;  %v1492_v41 = vmul.f32 %v1491_v34, %v1486_v35 }
 0x4c9   : > { %v1496_v39 = vsel %vm1211_vm10, %v1495_v38, 0.0 }
 0x4ca   : > { %v1483_v40 = vadd.f32 %v1482_v43, %v1469_v42  ;;  %v1505_v44 = vrot.slane %v1496_v39, %v4479_v20  ;;  %v1515_v47 = vrot.slane %v1496_v39, %v4476_v10 }
 0x4cc   : > { %v1493_v59 = vadd.f32 %v1492_v41, %v1483_v40  ;;  %v1506_v25 = vmul.f32 %v1505_v44, %v1500_v54  ;;  %v1516_v12 = vmul.f32 %v1515_v47, %v1510_v50  ;;  %v1549_v60 = vpop.permute.xlu1 %1548 }
 0x4ce   : > { %v1507_v22 = vadd.f32 %v1506_v25, %v1493_v59 }
 0x4d0   : > { %v1517_v24 = vadd.f32 %v1516_v12, %v1507_v22 }
 0x4d2   : > { %v1524_v26 = vadd.f32 %v1522_v8, %v1517_v24 }
 0x4d4   : > { %v2896_v30 = vmul.f32 -1.442695, %v1524_v26 }
 0x4d6   : > { %3778 = vpow2.f32 %v2896_v30 }
 0x4e0   : > { %v3779_v21 = vpop.eup %3778 }
 0x4e1   : > { %v1528_v32 = vadd.f32 1.0, %v3779_v21 }
 0x4e3   : > { %3780 = vrcp.f32 %v1528_v32 }
 0x4ed   : > { %v3781_v17 = vpop.eup %3780 }
 0x4ee   : > { %v1537_v33 = vrot.slane %v3781_v17, %v4479_v20  ;;  %v1541_v45 = vrot.slane %v3781_v17, %v4476_v10 }
 0x4f0   : > { %v1542_v46 = vsel %vm1531_vm15, %v1537_v33, %v1541_v45 }
 0x4f1   : > { %v1544_v29 = vmul.f32 %v1542_v46, %v4460_v13  ;;  %v4523_v13 = vsub.f32 %v4220_v63, %v4220_v63 }
 0x4f3   : > { %3332 = vmatpush3.msra.mxu1 %v1544_v29  ;;  %v4526_v10 = vand.u32 4294901760, %v4523_v13 }
 0x4f4   : > { %3334 = vmatmul.mubr.msk.f32.vlgmr.msra.gmra.mrb[4].mxu1 %vm410_vm1, %v1543_v57  ;;  %3336 = vmatprep.subr.msk.mxu1 %vm4211_vm2, %v3826_v6 }
 0x4f5   : > { %3337 = vmatpush3.msk.msra.mxu1 %vm4211_vm2, %v3826_v6  ;;  %v1934_v20 = vsub.f32 %v4523_v13, %v4526_v10 }
 0x4f7   : > { %v1935_v53 = vand.u32 4294901760, %v1934_v20 }
 0x4f9   : > { %3362 = vmatprep.subr.mxu1 %v1935_v53 }
 0x5c7   : > { %v1620_v51 = vpop.f32.mrb[4].mxu1 }
 0x5c8   : > { %v1621_v52 = vadd.f32 %v1620_v51, %v1549_v60  ;;  %v3335_v0 = vpop.f32.mrb[5].mxu1 }
 0x5ca   : > { %1624 = vxpose.xlu0.b32.start.end [1/1] (short) %v1621_v52, 128 }
 0x64a   : > { %v1640_v55 = vpop.trf.xlu0 }
 0x64b   : > { %v1657_v56 = vsel %vm410_vm1, %v1640_v55, 0 }
 0x64c   : > { %v4531_v58 = vand.u32 4294901760, %v1657_v56 }
 0x64e   : > { %v4534_v2 = vsub.f32 %v1657_v56, %v4531_v58  ;;  %v1641_v9 = vpop.trf.xlu0 }
 0x64f   : > { %v1660_v63 = vsel %vm410_vm1, %v1641_v9, 0 }
 0x650   : > { %v1772_v11 = vand.u32 4294901760, %v4534_v2  ;;  %v4538_v49 = vand.u32 4294901760, %v1660_v63 }
 0x652   : > { %v4541_v27 = vsub.f32 %v1660_v63, %v4538_v49  ;;  %v1642_v14 = vpop.trf.xlu0  ;;  %v1773_v50 = vsub.f32 %v4534_v2, %v1772_v11 }
 0x653   : > { %v1663_v5 = vsel %vm410_vm1, %v1642_v14, 0 }
 0x654   : > { %v1782_v23 = vand.u32 4294901760, %v4541_v27  ;;  %v4548_v48 = vand.u32 4294901760, %v1663_v5  ;;  %v1774_v28 = vand.u32 4294901760, %v1773_v50 }
 0x656   : > { %v1783_v36 = vsub.f32 %v4541_v27, %v1782_v23  ;;  %v4554_v1 = vsub.f32 %v1663_v5, %v4548_v48  ;;  %3338 = vmatprep.mubr.f32.mxu1 %v1774_v28  ;;  %v1643_v37 = vpop.trf.xlu0 }
 0x657   : > { %v1666_v16 = vsel %vm410_vm1, %v1643_v37, 0 }
 0x658   : > { %v1784_v31 = vand.u32 4294901760, %v1783_v36  ;;  %v1792_v18 = vand.u32 4294901760, %v4554_v1  ;;  %v4558_v61 = vand.u32 4294901760, %v1666_v16 }
 0x65a   : > { %v4561_v3 = vsub.f32 %v1666_v16, %v4558_v61  ;;  %3339 = vmatmul.mubr.f32.vlgmr.msra.gmra.mrb[6].mxu1 %v1784_v31  ;;  %v1644_v4 = vpop.trf.xlu0  ;;  %v1793_v7 = vsub.f32 %v4554_v1, %v1792_v18 }
 0x65b   : > { %v1669_v15 = vsel %vm410_vm1, %v1644_v4, 0  ;;  %3363 = vmatpush3.msra.mxu1 %v1935_v53 }
 0x65c   : > { %v1802_v19 = vand.u32 4294901760, %v4561_v3  ;;  %v4568_v34 = vand.u32 4294901760, %v1669_v15  ;;  %v1794_v35 = vand.u32 4294901760, %v1793_v7  ;;  %3388 = vmatprep.subr.mxu1 %v4523_v13 }
 0x65e   : > { %v4572_v42 = vsub.f32 %v1669_v15, %v4568_v34  ;;  %3341 = vmatprep.mubr.f32.mxu1 %v1794_v35  ;;  %v1645_v43 = vpop.trf.xlu0  ;;  %v1803_v38 = vsub.f32 %v4561_v3, %v1802_v19 }
 0x65f   : > { %v1672_v39 = vsel %vm410_vm1, %v1645_v43, 0 }
 0x660   : > { %v1812_v40 = vand.u32 4294901760, %v4572_v42  ;;  %v4579_v41 = vand.u32 4294901760, %v1672_v39  ;;  %v1804_v44 = vand.u32 4294901760, %v1803_v38 }
 0x662   : > { %v4582_v47 = vsub.f32 %v1672_v39, %v4579_v41  ;;  %3342 = vmatmul.mubr.f32.gmra.mrb[8].mxu1 %v1804_v44  ;;  %v1646_v54 = vpop.trf.xlu0  ;;  %v1813_v59 = vsub.f32 %v4572_v42, %v1812_v40 }
 0x663   : > { %v1675_v25 = vsel %vm410_vm1, %v1646_v54, 0 }
 0x664   : > { %v1822_v12 = vand.u32 4294901760, %v4582_v47  ;;  %v4589_v22 = vand.u32 4294901760, %v1675_v25  ;;  %v1814_v24 = vand.u32 4294901760, %v1813_v59 }
 0x666   : > { %v4592_v8 = vsub.f32 %v1675_v25, %v4589_v22  ;;  %3344 = vmatprep.mubr.f32.mxu1 %v1814_v24  ;;  %v1647_v26 = vpop.trf.xlu0  ;;  %v1823_v30 = vsub.f32 %v4582_v47, %v1822_v12 }
 0x667   : > { %v1678_v21 = vsel %vm410_vm1, %v1647_v26, 0 }
 0x668   : > { %v1832_v32 = vand.u32 4294901760, %v4592_v8  ;;  %v4599_v17 = vand.u32 4294901760, %v1678_v21  ;;  %v1824_v33 = vand.u32 4294901760, %v1823_v30 }
 0x66a   : > { %v4602_v45 = vsub.f32 %v1678_v21, %v4599_v17  ;;  %3345 = vmatmul.mubr.f32.gmra.mrb[10].mxu1 %v1824_v33  ;;  %v1648_v46 = vpop.trf.xlu0  ;;  %v1833_v29 = vsub.f32 %v4592_v8, %v1832_v32 }
 0x66b   : > { %v1681_v57 = vsel %vm410_vm1, %v1648_v46, 0 }
 0x66c   : > { %v1842_v60 = vand.u32 4294901760, %v4602_v45  ;;  %v4609_v51 = vand.u32 4294901760, %v1681_v57  ;;  %v1834_v52 = vand.u32 4294901760, %v1833_v29 }
 0x66e   : > { %v4612_v0 = vsub.f32 %v1681_v57, %v4609_v51  ;;  %3347 = vmatprep.mubr.f32.mxu1 %v1834_v52  ;;  %v1649_v20 = vpop.trf.xlu0  ;;  %v1843_v53 = vsub.f32 %v4602_v45, %v1842_v60 }
 0x66f   : > { %v1684_v55 = vsel %vm410_vm1, %v1649_v20, 0 }
 0x670   : > { %v1852_v56 = vand.u32 4294901760, %v4612_v0  ;;  %v4619_v9 = vand.u32 4294901760, %v1684_v55  ;;  %v1844_v63 = vand.u32 4294901760, %v1843_v53 }
 0x672   : > { %v4622_v14 = vsub.f32 %v1684_v55, %v4619_v9  ;;  %3348 = vmatmul.mubr.f32.gmra.mrb[12].mxu1 %v1844_v63  ;;  %v1650_v50 = vpop.trf.xlu0  ;;  %v1853_v5 = vsub.f32 %v4612_v0, %v1852_v56 }
 0x673   : > { %v1687_v28 = vsel %vm410_vm1, %v1650_v50, 0 }
 0x674   : > { %v1862_v36 = vand.u32 4294901760, %v4622_v14  ;;  %v4629_v37 = vand.u32 4294901760, %v1687_v28  ;;  %v1854_v16 = vand.u32 4294901760, %v1853_v5 }
 0x676   : > { %v4632_v31 = vsub.f32 %v1687_v28, %v4629_v37  ;;  %3350 = vmatprep.mubr.f32.mxu1 %v1854_v16  ;;  %v1651_v4 = vpop.trf.xlu0  ;;  %v1863_v7 = vsub.f32 %v4622_v14, %v1862_v36 }
 0x677   : > { %v1690_v15 = vsel %vm410_vm1, %v1651_v4, 0 }
 0x678   : > { %v1872_v35 = vand.u32 4294901760, %v4632_v31  ;;  %v4639_v43 = vand.u32 4294901760, %v1690_v15  ;;  %v1864_v38 = vand.u32 4294901760, %v1863_v7 }
 0x67a   : > { %v4642_v39 = vsub.f32 %v1690_v15, %v4639_v43  ;;  %3351 = vmatmul.mubr.f32.gmra.mrb[14].mxu1 %v1864_v38  ;;  %v1652_v44 = vpop.trf.xlu0  ;;  %v1873_v54 = vsub.f32 %v4632_v31, %v1872_v35 }
 0x67b   : > { %v1693_v59 = vsel %vm410_vm1, %v1652_v44, 0 }
 0x67c   : > { %v1882_v25 = vand.u32 4294901760, %v4642_v39  ;;  %v4649_v24 = vand.u32 4294901760, %v1693_v59  ;;  %v1874_v26 = vand.u32 4294901760, %v1873_v54 }
 0x67e   : > { %v4652_v30 = vsub.f32 %v1693_v59, %v4649_v24  ;;  %3353 = vmatprep.mubr.f32.mxu1 %v1874_v26  ;;  %v1653_v21 = vpop.trf.xlu0  ;;  %v1883_v33 = vsub.f32 %v4642_v39, %v1882_v25 }
 0x67f   : > { %v1696_v46 = vsel %vm410_vm1, %v1653_v21, 0 }
 0x680   : > { %v1892_v29 = vand.u32 4294901760, %v4652_v30  ;;  %v4659_v57 = vand.u32 4294901760, %v1696_v46  ;;  %v1884_v52 = vand.u32 4294901760, %v1883_v33 }
 0x682   : > { %v4662_v20 = vsub.f32 %v1696_v46, %v4659_v57  ;;  %3354 = vmatmul.mubr.f32.gmra.mrb[16].mxu1 %v1884_v52  ;;  %v1654_v53 = vpop.trf.xlu0  ;;  %v1893_v55 = vsub.f32 %v4652_v30, %v1892_v29 }
 0x683   : > { %v1699_v63 = vsel %vm410_vm1, %v1654_v53, 0 }
 0x684   : > { %v1902_v50 = vand.u32 4294901760, %v4662_v20  ;;  %v4669_v5 = vand.u32 4294901760, %v1699_v63  ;;  %v1894_v28 = vand.u32 4294901760, %v1893_v55  ;;  %v3797_v55 = vld [vmem:[%s3909_s22 + $0x70] sm:$0xff] }
 0x686   : > { %v4672_v16 = vsub.f32 %v1699_v63, %v4669_v5  ;;  %3356 = vmatprep.mubr.f32.mxu1 %v1894_v28  ;;  %v1655_v4 = vpop.trf.xlu0  ;;  %v1903_v7 = vsub.f32 %v4662_v20, %v1902_v50 }
 0x687   : > { %v1702_v15 = vsel %vm410_vm1, %v1655_v4, 0 }
 0x688   : > { %v1912_v38 = vand.u32 4294901760, %v4672_v16  ;;  %v4679_v44 = vand.u32 4294901760, %v1702_v15  ;;  %v1904_v54 = vand.u32 4294901760, %v1903_v7 }
 0x68a   : > { %v1921_v59 = vsub.f32 %v1702_v15, %v4679_v44  ;;  %3357 = vmatmul.mubr.f32.gmra.mrb[18].mxu1 %v1904_v54  ;;  %v1913_v26 = vsub.f32 %v4672_v16, %v1912_v38 }
 0x68c   : > { %v1922_v21 = vand.u32 4294901760, %v1921_v59  ;;  %v1914_v33 = vand.u32 4294901760, %v1913_v26 }
 0x68e   : > { %3359 = vmatprep.mubr.f32.mxu1 %v1914_v33  ;;  %v1923_v46 = vsub.f32 %v1921_v59, %v1922_v21 }
 0x690   : > { %v1924_v52 = vand.u32 4294901760, %v1923_v46 }
 0x692   : > { %3360 = vmatmul.mubr.f32.gmra.mrb[20].mxu1 %v1924_v52 }
 0x693   : > { %3364 = vmatprep.mubr.f32.mxu1 %v4531_v58 }
 0x696   : > { %3365 = vmatmul.mubr.f32.vlgmr.msra.gmra.mrb[6].mxu1 %v4538_v49 }
 0x697   : > { %3367 = vmatprep.mubr.f32.mxu1 %v4548_v48  ;;  %3389 = vmatpush3.msra.mxu1 %v4523_v13 }
 0x698   : > { %3414 = vmatprep.subr.msk.mxu1 %vm4211_vm2, %v3826_v6 }
 0x69a   : > { %3368 = vmatmul.mubr.f32.gmra.mrb[8].mxu1 %v4558_v61 }
 0x69b   : > { %3370 = vmatprep.mubr.f32.mxu1 %v4568_v34 }
 0x69e   : > { %3371 = vmatmul.mubr.f32.gmra.mrb[10].mxu1 %v4579_v41 }
 0x69f   : > { %3373 = vmatprep.mubr.f32.mxu1 %v4589_v22 }
 0x6a2   : > { %3374 = vmatmul.mubr.f32.gmra.mrb[12].mxu1 %v4599_v17 }
 0x6a3   : > { %3376 = vmatprep.mubr.f32.mxu1 %v4609_v51 }
 0x6a6   : > { %3377 = vmatmul.mubr.f32.gmra.mrb[14].mxu1 %v4619_v9 }
 0x6a7   : > { %3379 = vmatprep.mubr.f32.mxu1 %v4629_v37 }
 0x6aa   : > { %3380 = vmatmul.mubr.f32.gmra.mrb[16].mxu1 %v4639_v43 }
 0x6ab   : > { %3382 = vmatprep.mubr.f32.mxu1 %v4649_v24 }
 0x6ae   : > { %3383 = vmatmul.mubr.f32.gmra.mrb[18].mxu1 %v4659_v57 }
 0x6af   : > { %3385 = vmatprep.mubr.f32.mxu1 %v4669_v5 }
 0x6b2   : > { %3386 = vmatmul.mubr.f32.gmra.mrb[20].mxu1 %v4679_v44 }
 0x6b3   : > { %3390 = vmatprep.mubr.f32.mxu1 %v4534_v2 }
 0x6b6   : > { %3391 = vmatmul.mubr.f32.vlgmr.msra.gmra.mrb[6].mxu1 %v4541_v27 }
 0x6b7   : > { %3393 = vmatprep.mubr.f32.mxu1 %v4554_v1  ;;  %3415 = vmatpush3.msk.msra.mxu1 %vm4211_vm2, %v3826_v6 }
 0x6b8   : > { %3440 = vmatprep.subr.mxu1 %v4526_v10 }
 0x6ba   : > { %3394 = vmatmul.mubr.f32.gmra.mrb[8].mxu1 %v4561_v3 }
 0x6bb   : > { %3396 = vmatprep.mubr.f32.mxu1 %v4572_v42 }
 0x6be   : > { %3397 = vmatmul.mubr.f32.gmra.mrb[10].mxu1 %v4582_v47 }
 0x6bf   : > { %3399 = vmatprep.mubr.f32.mxu1 %v4592_v8 }
 0x6c2   : > { %3400 = vmatmul.mubr.f32.gmra.mrb[12].mxu1 %v4602_v45 }
 0x6c3   : > { %3402 = vmatprep.mubr.f32.mxu1 %v4612_v0 }
 0x6c6   : > { %3403 = vmatmul.mubr.f32.gmra.mrb[14].mxu1 %v4622_v14 }
 0x6c7   : > { %3405 = vmatprep.mubr.f32.mxu1 %v4632_v31 }
 0x6ca   : > { %3406 = vmatmul.mubr.f32.gmra.mrb[16].mxu1 %v4642_v39 }
 0x6cb   : > { %3408 = vmatprep.mubr.f32.mxu1 %v4652_v30 }
 0x6ce   : > { %3409 = vmatmul.mubr.f32.gmra.mrb[18].mxu1 %v4662_v20 }
 0x6cf   : > { %3411 = vmatprep.mubr.f32.mxu1 %v4672_v16 }
 0x6d2   : > { %3412 = vmatmul.mubr.f32.gmra.mrb[20].mxu1 %v1921_v59 }
 0x6d3   : > { %3416 = vmatprep.mubr.f32.mxu1 %v1772_v11 }
 0x6d6   : > { %3417 = vmatmul.mubr.f32.vlgmr.msra.gmra.mrb[6].mxu1 %v1782_v23 }
 0x6d7   : > { %3419 = vmatprep.mubr.f32.mxu1 %v1792_v18  ;;  %3441 = vmatpush3.msra.mxu1 %v4526_v10 }
 0x6d8   : > { %3466 = vmatprep.subr.msk.mxu1 %vm4211_vm2, %v3826_v6 }
 0x6da   : > { %3420 = vmatmul.mubr.f32.gmra.mrb[8].mxu1 %v1802_v19 }
 0x6db   : > { %3422 = vmatprep.mubr.f32.mxu1 %v1812_v40 }
 0x6de   : > { %3423 = vmatmul.mubr.f32.gmra.mrb[10].mxu1 %v1822_v12 }
 0x6df   : > { %3425 = vmatprep.mubr.f32.mxu1 %v1832_v32 }
 0x6e2   : > { %3426 = vmatmul.mubr.f32.gmra.mrb[12].mxu1 %v1842_v60 }
 0x6e3   : > { %3428 = vmatprep.mubr.f32.mxu1 %v1852_v56 }
 0x6e6   : > { %3429 = vmatmul.mubr.f32.gmra.mrb[14].mxu1 %v1862_v36 }
 0x6e7   : > { %3431 = vmatprep.mubr.f32.mxu1 %v1872_v35 }
 0x6ea   : > { %3432 = vmatmul.mubr.f32.gmra.mrb[16].mxu1 %v1882_v25 }
 0x6eb   : > { %3434 = vmatprep.mubr.f32.mxu1 %v1892_v29 }
 0x6ee   : > { %3435 = vmatmul.mubr.f32.gmra.mrb[18].mxu1 %v1902_v50 }
 0x6ef   : > { %3437 = vmatprep.mubr.f32.mxu1 %v1912_v38 }
 0x6f2   : > { %3438 = vmatmul.mubr.f32.gmra.mrb[20].mxu1 %v1922_v21 }
 0x6f3   : > { %3442 = vmatprep.mubr.f32.mxu1 %v4531_v58 }
 0x6f6   : > { %3443 = vmatmul.mubr.f32.vlgmr.msra.gmra.mrb[6].mxu1 %v4538_v49 }
 0x6f7   : > { %3445 = vmatprep.mubr.f32.mxu1 %v4548_v48  ;;  %3467 = vmatpush3.msk.msra.mxu1 %vm4211_vm2, %v3826_v6  ;;  %v3782_v6 = vld [vmem:[%s3909_s22 + $0x8] sm:$0xff] }
 0x6fa   : > { %3446 = vmatmul.mubr.f32.gmra.mrb[8].mxu1 %v4558_v61 }
 0x6fb   : > { %3448 = vmatprep.mubr.f32.mxu1 %v4568_v34 }
 0x6fe   : > { %3449 = vmatmul.mubr.f32.gmra.mrb[10].mxu1 %v4579_v41 }
 0x6ff   : > { %3451 = vmatprep.mubr.f32.mxu1 %v4589_v22 }
 0x702   : > { %3452 = vmatmul.mubr.f32.gmra.mrb[12].mxu1 %v4599_v17 }
 0x703   : > { %3454 = vmatprep.mubr.f32.mxu1 %v4609_v51 }
 0x706   : > { %3455 = vmatmul.mubr.f32.gmra.mrb[14].mxu1 %v4619_v9 }
 0x707   : > { %3457 = vmatprep.mubr.f32.mxu1 %v4629_v37 }
 0x70a   : > { %3458 = vmatmul.mubr.f32.gmra.mrb[16].mxu1 %v4639_v43 }
 0x70b   : > { %3460 = vmatprep.mubr.f32.mxu1 %v4649_v24 }
 0x70e   : > { %3461 = vmatmul.mubr.f32.gmra.mrb[18].mxu1 %v4659_v57 }
 0x70f   : > { %3463 = vmatprep.mubr.f32.mxu1 %v4669_v5 }
 0x712   : > { %3464 = vmatmul.mubr.f32.gmra.mrb[20].mxu1 %v4679_v44 }
 0x713   : > { %3468 = vmatprep.mubr.f32.mxu1 %v4531_v58  ;;  %v3783_v58 = vld [vmem:[%s3909_s22] sm:$0xff] }
 0x716   : > { %3469 = vmatmul.mubr.f32.vlgmr.msra.gmra.mrb[6].mxu1 %v4538_v49  ;;  %v3784_v49 = vld [vmem:[%s3909_s22 + $0x18] sm:$0xff] }
 0x717   : > { %3471 = vmatprep.mubr.f32.mxu1 %v4548_v48  ;;  %v3785_v48 = vld [vmem:[%s3909_s22 + $0x10] sm:$0xff] }
 0x71a   : > { %3472 = vmatmul.mubr.f32.gmra.mrb[8].mxu1 %v4558_v61  ;;  %v3786_v61 = vld [vmem:[%s3909_s22 + $0x28] sm:$0xff] }
 0x71b   : > { %3474 = vmatprep.mubr.f32.mxu1 %v4568_v34  ;;  %v3787_v34 = vld [vmem:[%s3909_s22 + $0x20] sm:$0xff] }
 0x71e   : > { %3475 = vmatmul.mubr.f32.gmra.mrb[10].mxu1 %v4579_v41  ;;  %v3788_v41 = vld [vmem:[%s3909_s22 + $0x38] sm:$0xff] }
 0x71f   : > { %3477 = vmatprep.mubr.f32.mxu1 %v4589_v22  ;;  %v3789_v22 = vld [vmem:[%s3909_s22 + $0x30] sm:$0xff] }
 0x722   : > { %3478 = vmatmul.mubr.f32.gmra.mrb[12].mxu1 %v4599_v17  ;;  %v3790_v17 = vld [vmem:[%s3909_s22 + $0x48] sm:$0xff] }
 0x723   : > { %3480 = vmatprep.mubr.f32.mxu1 %v4609_v51  ;;  %v3791_v51 = vld [vmem:[%s3909_s22 + $0x40] sm:$0xff] }
 0x726   : > { %3481 = vmatmul.mubr.f32.gmra.mrb[14].mxu1 %v4619_v9  ;;  %v3792_v9 = vld [vmem:[%s3909_s22 + $0x58] sm:$0xff] }
 0x727   : > { %3483 = vmatprep.mubr.f32.mxu1 %v4629_v37  ;;  %v3793_v37 = vld [vmem:[%s3909_s22 + $0x50] sm:$0xff] }
 0x72a   : > { %3484 = vmatmul.mubr.f32.gmra.mrb[16].mxu1 %v4639_v43  ;;  %v3794_v43 = vld [vmem:[%s3909_s22 + $0x68] sm:$0xff] }
 0x72b   : > { %3486 = vmatprep.mubr.f32.mxu1 %v4649_v24  ;;  %v3795_v24 = vld [vmem:[%s3909_s22 + $0x60] sm:$0xff] }
 0x72e   : > { %3487 = vmatmul.mubr.f32.gmra.mrb[18].mxu1 %v4659_v57  ;;  %v3796_v57 = vld [vmem:[%s3909_s22 + $0x78] sm:$0xff] }
 0x72f   : > { %3489 = vmatprep.mubr.f32.mxu1 %v4669_v5 }
 0x732   : > { %3490 = vmatmul.mubr.f32.gmra.mrb[20].mxu1 %v4679_v44 }
 0x7e9   : > { %v3470_v62 = vpop.f32.mrb[6].mxu1 }
 0x7ea   : > { %v2796_v13 = vmul.f32 %v3782_v6, %v3470_v62  ;;  %v2701_v10 = vpop.f32.mrb[7].mxu1 }
 0x7eb   : > { %v2795_v2 = vmul.f32 %v3783_v58, %v2701_v10 }
 0x7ec   : > { %2812 = vst.msk [vmem:[%s4798_s12 + $0x8] sm:$0xff] %vm410_vm1, %v2796_v13 }
 0x7ed   : > { %2811 = vst.msk [vmem:[%s4798_s12] sm:$0xff] %vm410_vm1, %v2795_v2  ;;  %v3473_v11 = vpop.f32.mrb[8].mxu1 }
 0x7ee   : > { %v2798_v27 = vmul.f32 %v3784_v49, %v3473_v11  ;;  %v2713_v23 = vpop.f32.mrb[9].mxu1 }
 0x7ef   : > { %v2797_v1 = vmul.f32 %v3785_v48, %v2713_v23 }
 0x7f0   : > { %2814 = vst.msk [vmem:[%s4798_s12 + $0x18] sm:$0xff] %vm410_vm1, %v2798_v27 }
 0x7f1   : > { %2813 = vst.msk [vmem:[%s4798_s12 + $0x10] sm:$0xff] %vm410_vm1, %v2797_v1  ;;  %v3476_v18 = vpop.f32.mrb[10].mxu1 }
 0x7f2   : > { %v2800_v3 = vmul.f32 %v3786_v61, %v3476_v18  ;;  %v2725_v19 = vpop.f32.mrb[11].mxu1 }
 0x7f3   : > { %v2799_v42 = vmul.f32 %v3787_v34, %v2725_v19 }
 0x7f4   : > { %2816 = vst.msk [vmem:[%s4798_s12 + $0x28] sm:$0xff] %vm410_vm1, %v2800_v3 }
 0x7f5   : > { %2815 = vst.msk [vmem:[%s4798_s12 + $0x20] sm:$0xff] %vm410_vm1, %v2799_v42  ;;  %v3479_v40 = vpop.f32.mrb[12].mxu1 }
 0x7f6   : > { %v2802_v47 = vmul.f32 %v3788_v41, %v3479_v40  ;;  %v2737_v12 = vpop.f32.mrb[13].mxu1 }
 0x7f7   : > { %v2801_v8 = vmul.f32 %v3789_v22, %v2737_v12 }
 0x7f8   : > { %2818 = vst.msk [vmem:[%s4798_s12 + $0x38] sm:$0xff] %vm410_vm1, %v2802_v47 }
 0x7f9   : > { %2817 = vst.msk [vmem:[%s4798_s12 + $0x30] sm:$0xff] %vm410_vm1, %v2801_v8  ;;  %v3482_v32 = vpop.f32.mrb[14].mxu1 }
 0x7fa   : > { %v2804_v45 = vmul.f32 %v3790_v17, %v3482_v32  ;;  %v2749_v60 = vpop.f32.mrb[15].mxu1 }
 0x7fb   : > { %v2803_v0 = vmul.f32 %v3791_v51, %v2749_v60 }
 0x7fc   : > { %2820 = vst.msk [vmem:[%s4798_s12 + $0x48] sm:$0xff] %vm410_vm1, %v2804_v45 }
 0x7fd   : > { %2819 = vst.msk [vmem:[%s4798_s12 + $0x40] sm:$0xff] %vm410_vm1, %v2803_v0  ;;  %v3485_v56 = vpop.f32.mrb[16].mxu1 }
 0x7fe   : > { %v2806_v14 = vmul.f32 %v3792_v9, %v3485_v56  ;;  %v2761_v36 = vpop.f32.mrb[17].mxu1 }
 0x7ff   : > { %v2805_v31 = vmul.f32 %v3793_v37, %v2761_v36 }
 0x800   : > { %2822 = vst.msk [vmem:[%s4798_s12 + $0x58] sm:$0xff] %vm410_vm1, %v2806_v14 }
 0x801   : > { %2821 = vst.msk [vmem:[%s4798_s12 + $0x50] sm:$0xff] %vm410_vm1, %v2805_v31  ;;  %v3488_v35 = vpop.f32.mrb[18].mxu1 }
 0x802   : > { %v2808_v39 = vmul.f32 %v3794_v43, %v3488_v35  ;;  %v2773_v25 = vpop.f32.mrb[19].mxu1 }
 0x803   : > { %v2807_v30 = vmul.f32 %v3795_v24, %v2773_v25 }
 0x804   : > { %2824 = vst.msk [vmem:[%s4798_s12 + $0x68] sm:$0xff] %vm410_vm1, %v2808_v39 }
 0x805   : > { %2823 = vst.msk [vmem:[%s4798_s12 + $0x60] sm:$0xff] %vm410_vm1, %v2807_v30  ;;  %v3491_v29 = vpop.f32.mrb[20].mxu1 }
 0x806   : > { %v2810_v20 = vmul.f32 %v3796_v57, %v3491_v29  ;;  %v2785_v53 = vpop.f32.mrb[21].mxu1 }
 0x807   : > { %v2809_v63 = vmul.f32 %v3797_v55, %v2785_v53 }
 0x808   : > { %2826 = vst.msk [vmem:[%s4798_s12 + $0x78] sm:$0xff] %vm410_vm1, %v2810_v20 }
 0x809   : > { %2825 = vst.msk [vmem:[%s4798_s12 + $0x70] sm:$0xff] %vm410_vm1, %v2809_v63 }
 0x80a PF: > { %s21_s17 = sadd.s32 1, %s3804_s17  }
 0x80b   : > { %p18_p4 = scmp.ge.s32.totalorder %s21_s17, 4  }
 0x80d   :  { %20 = sbr.rel (!%p18_p4) target bundleno = 1 (0x1), region = 94 }

</bundles_post_ra>
